<compile_context>
chip_gen: v7x
topology: tpu7x:2x2x1
jax: 0.10.0
libtpu: 0.0.40
codegen_flags: <defaults>
</compile_context>

<pallas_src>
import math

import jax
import jax.numpy as jnp
from jax.experimental import pallas as pl
from jax.experimental.pallas import tpu as pltpu


def _round_up(x, m):
    return ((x + m - 1) // m) * m


def _vision_classifier_kernel(x_ref, w1_ref, b1_ref, w2_ref, b2_ref,
                              w3_ref, b3_ref, out_ref, acc_ref):
    """Stream embedding tiles; accumulate pooled sum; run the MLP on the last step."""
    k = pl.program_id(1)                       # token-reduction axis (last grid axis)

    @pl.when(k == 0)
    def _():
        acc_ref[...] = jnp.zeros_like(acc_ref)

    # (b_tile, t_tile, D) tile -> f32 partial sum over the token axis (VPU/XLU,
    # hidden under the streaming DMA). Upcast per tile so bf16 inputs also work.
    x = x_ref[...].astype(jnp.float32)
    acc_ref[...] += jnp.sum(x, axis=1)         # (b_tile, D)

    @pl.when(k == pl.num_programs(1) - 1)
    def _():
        pooled = acc_ref[...]                  # (b_tile, D); 1/T already folded into w1
        h = jnp.dot(pooled, w1_ref[...],
                    preferred_element_type=jnp.float32) + b1_ref[...]   # (b_tile, H)
        h = jnp.maximum(h, 0.0)                # ReLU
        # Dropout(p=0.3): identity in eval/inference mode.
        h = jnp.dot(h, w2_ref[...],
                    preferred_element_type=jnp.float32) + b2_ref[...]   # (b_tile, H)
        h = jnp.maximum(h, 0.0)
        # Dropout(p=0.3): identity in eval/inference mode.
        out = jnp.dot(h, w3_ref[...],
                      preferred_element_type=jnp.float32) + b3_ref[...]  # (b_tile, C_pad)
        out_ref[...] = out.astype(out_ref.dtype)


def vision_classifier_forward(vision_embeddings, params, *, b_tile=8, t_tile=128):
    """vision_embeddings: (B, T0, T1, T2, D). Returns (B, num_classes) float32."""
    w1, b1, w2, b2, w3, b3 = params
    B = vision_embeddings.shape[0]
    D = vision_embeddings.shape[-1]
    T = math.prod(vision_embeddings.shape[1:-1])
    H = w1.shape[1]
    C = w3.shape[1]

    # Fold the 1/T mean-pool scale into W1 (kernel accumulates a SUM, not a mean).
    w1 = (w1.astype(jnp.float32) / jnp.float32(T))

    # Lane-dense logits: pad num_classes up to a multiple of 128, slice afterwards.
    C_pad = _round_up(max(C, 128), 128)
    w3p = jnp.zeros((H, C_pad), jnp.float32).at[:, :C].set(w3)
    b3p = jnp.zeros((1, C_pad), jnp.float32).at[:, :C].set(b3)

    # Tile sizes: keep (8,128) alignment; zero-pad B and T so blocks tile evenly.
    # Zero tokens / zero batch rows do not perturb the pooled sum; padded rows are
    # sliced off after the call. Scale uses the TRUE T (folded into w1 above).
    b_tile = min(b_tile, _round_up(B, 8))
    t_tile = min(t_tile, _round_up(T, 8))
    B_pad = _round_up(B, b_tile)
    T_pad = _round_up(T, t_tile)

    x = vision_embeddings.reshape(B, T, D)
    if (B_pad, T_pad) != (B, T):
        x = jnp.pad(x, ((0, B_pad - B), (0, T_pad - T), (0, 0)))

    grid = (B_pad // b_tile, T_pad // t_tile)

    dtype_bytes = x.dtype.itemsize
    cost = pl.CostEstimate(
        flops=2 * B_pad * (T_pad * D + D * H + H * H + H * C_pad),
        transcendentals=0,
        bytes_accessed=(B_pad * T_pad * D * dtype_bytes
                        + (D * H + H * H + H * C_pad + 2 * H + C_pad) * 4
                        + B_pad * C_pad * 4),
    )

    out = pl.pallas_call(
        _vision_classifier_kernel,
        out_shape=jax.ShapeDtypeStruct((B_pad, C_pad), jnp.float32),
        grid_spec=pltpu.PrefetchScalarGridSpec(
            num_scalar_prefetch=0,
            grid=grid,
            in_specs=[
                # Streaming embedding tiles (double-buffered by the pipeline).
                pl.BlockSpec((b_tile, t_tile, D), lambda i, k: (i, k, 0)),
                # Grid-invariant (resident) weights / biases.
                pl.BlockSpec((D, H), lambda i, k: (0, 0)),
                pl.BlockSpec((1, H), lambda i, k: (0, 0)),
                pl.BlockSpec((H, H), lambda i, k: (0, 0)),
                pl.BlockSpec((1, H), lambda i, k: (0, 0)),
                pl.BlockSpec((H, C_pad), lambda i, k: (0, 0)),
                pl.BlockSpec((1, C_pad), lambda i, k: (0, 0)),
            ],
            out_specs=pl.BlockSpec((b_tile, C_pad), lambda i, k: (i, 0)),
            scratch_shapes=[pltpu.VMEM((b_tile, D), jnp.float32)],
        ),
        compiler_params=pltpu.CompilerParams(
            dimension_semantics=("parallel", "arbitrary"),
            vmem_limit_bytes=32 * 1024 * 1024,
        ),
        cost_estimate=cost,
    )(x, w1, b1, w2, b2, w3p, b3p)

    return out[:B, :C]


def init_params(key, in_dim=1408, hidden_dim=128, num_classes=10):
    """Deterministic synthetic init (uniform, roughly matching nn.Linear scale)."""
    ks = jax.random.split(key, 6)

    def lin(kw, kb, fan_in, fan_out):
        bound = 1.0 / math.sqrt(fan_in)
        w = jax.random.uniform(kw, (fan_in, fan_out), jnp.float32, -bound, bound)
        b = jax.random.uniform(kb, (1, fan_out), jnp.float32, -bound, bound)
        return w, b

    w1, b1 = lin(ks[0], ks[1], in_dim, hidden_dim)
    w2, b2 = lin(ks[2], ks[3], hidden_dim, hidden_dim)
    w3, b3 = lin(ks[4], ks[5], hidden_dim, num_classes)
    return (w1, b1, w2, b2, w3, b3)


def reference_forward(vision_embeddings, params):
    """Pure-JAX reference for correctness checking."""
    w1, b1, w2, b2, w3, b3 = params
    x = jnp.mean(vision_embeddings, axis=(1, 2, 3))
    h = jnp.maximum(x @ w1 + b1, 0.0)
    h = jnp.maximum(h @ w2 + b2, 0.0)
    return h @ w3 + b3


if __name__ == "__main__":
    key = jax.random.PRNGKey(0)
    k_x, k_p = jax.random.split(key)

    # Small shapes consistent with the module: (B, T0, T1, T2, 1408).
    B, T0, T1, T2, D = 2, 2, 4, 4, 1408
    hidden_dim, num_classes = 128, 10

    x = jax.random.normal(k_x, (B, T0, T1, T2, D), dtype=jnp.float32)
    params = init_params(k_p, in_dim=D, hidden_dim=hidden_dim,
                         num_classes=num_classes)

    out = vision_classifier_forward(x, params)
    out = jax.block_until_ready(out)

    ref = reference_forward(x, params)
    assert out.shape == (B, num_classes)
    assert jnp.allclose(out, ref, atol=1e-4, rtol=1e-4), \
        float(jnp.max(jnp.abs(out - ref)))

    print("KERNEL_OK")
</pallas_src>

<mosaic_0001>
module attributes {stable_mosaic.version = 11 : i64} {
  func.func @_vision_classifier_kernel(%arg0: i32, %arg1: i32, %arg2: memref<8x32x1408xf32, #tpu.memory_space<vmem>>, %arg3: memref<1408x128xf32, #tpu.memory_space<vmem>>, %arg4: memref<1x128xf32, #tpu.memory_space<vmem>>, %arg5: memref<128x128xf32, #tpu.memory_space<vmem>>, %arg6: memref<1x128xf32, #tpu.memory_space<vmem>>, %arg7: memref<128x128xf32, #tpu.memory_space<vmem>>, %arg8: memref<1x128xf32, #tpu.memory_space<vmem>>, %arg9: memref<8x128xf32, #tpu.memory_space<vmem>>, %arg10: memref<8x1408xf32, #tpu.memory_space<vmem>>) attributes {dimension_semantics = [#tpu.dimension_semantics<parallel>, #tpu.dimension_semantics<arbitrary>], iteration_bounds = array<i64: 1, 1>, scalar_prefetch = 0 : i64, scratch_operands = 1 : i64, tpu.core_type = #tpu.core_type<tc>, window_params = [{transform_indices = @transform_0, window_bounds = array<i64: 8, 32, 1408>}, {pipeline_mode = #tpu.pipeline_mode<synchronous>, transform_indices = @transform_1, window_bounds = array<i64: 1408, 128>}, {pipeline_mode = #tpu.pipeline_mode<synchronous>, transform_indices = @transform_2, window_bounds = array<i64: 1, 128>}, {pipeline_mode = #tpu.pipeline_mode<synchronous>, transform_indices = @transform_3, window_bounds = array<i64: 128, 128>}, {pipeline_mode = #tpu.pipeline_mode<synchronous>, transform_indices = @transform_4, window_bounds = array<i64: 1, 128>}, {pipeline_mode = #tpu.pipeline_mode<synchronous>, transform_indices = @transform_5, window_bounds = array<i64: 128, 128>}, {pipeline_mode = #tpu.pipeline_mode<synchronous>, transform_indices = @transform_6, window_bounds = array<i64: 1, 128>}, {transform_indices = @transform_7, window_bounds = array<i64: 8, 128>}]} {
    %c0_i32 = arith.constant 0 : i32
    %0 = arith.cmpi eq, %arg1, %c0_i32 : i32
    %1 = arith.extui %0 : i1 to i32
    %c0_i32_0 = arith.constant 0 : i32
    %2 = arith.cmpi ne, %1, %c0_i32_0 : i32
    scf.if %2 {
      %cst_9 = arith.constant 0.000000e+00 : f32
      %11 = vector.broadcast %cst_9 : f32 to vector<8x1408xf32>
      %c0_10 = arith.constant 0 : index
      %c0_11 = arith.constant 0 : index
      %12 = vector.load %arg10[%c0_10, %c0_11] : memref<8x1408xf32, #tpu.memory_space<vmem>>, vector<8x1408xf32>
      tpu.vector_store %arg10[%c0_10, %c0_11], %11 {strides = array<i32>} : memref<8x1408xf32, #tpu.memory_space<vmem>>, vector<8x1408xf32>,
    } else {
    }
    %c0 = arith.constant 0 : index
    %c0_1 = arith.constant 0 : index
    %c0_2 = arith.constant 0 : index
    %3 = vector.load %arg2[%c0, %c0_1, %c0_2] : memref<8x32x1408xf32, #tpu.memory_space<vmem>>, vector<8x32x1408xf32>
    %c0_3 = arith.constant 0 : index
    %c0_4 = arith.constant 0 : index
    %4 = vector.load %arg10[%c0_3, %c0_4] : memref<8x1408xf32, #tpu.memory_space<vmem>>, vector<8x1408xf32>
    %cst = arith.constant dense<0.000000e+00> : vector<8x1408xf32>
    %5 = vector.multi_reduction <add>, %3, %cst [1] : vector<8x32x1408xf32> to vector<8x1408xf32>
    %6 = arith.addf %4, %5 : vector<8x1408xf32>
    %c0_5 = arith.constant 0 : index
    %c0_6 = arith.constant 0 : index
    %7 = vector.load %arg10[%c0_5, %c0_6] : memref<8x1408xf32, #tpu.memory_space<vmem>>, vector<8x1408xf32>
    tpu.vector_store %arg10[%c0_5, %c0_6], %6 {strides = array<i32>} : memref<8x1408xf32, #tpu.memory_space<vmem>>, vector<8x1408xf32>,
    %c0_i32_7 = arith.constant 0 : i32
    %8 = arith.cmpi eq, %arg1, %c0_i32_7 : i32
    %9 = arith.extui %8 : i1 to i32
    %c0_i32_8 = arith.constant 0 : i32
    %10 = arith.cmpi ne, %9, %c0_i32_8 : i32
    scf.if %10 {
      %c0_9 = arith.constant 0 : index
      %c0_10 = arith.constant 0 : index
      %11 = vector.load %arg10[%c0_9, %c0_10] : memref<8x1408xf32, #tpu.memory_space<vmem>>, vector<8x1408xf32>
      %c0_11 = arith.constant 0 : index
      %c0_12 = arith.constant 0 : index
      %12 = vector.load %arg3[%c0_11, %c0_12] : memref<1408x128xf32, #tpu.memory_space<vmem>>, vector<1408x128xf32>
      %cst_13 = arith.constant dense<0.000000e+00> : vector<8x128xf32>
      %13 = tpu.matmul %11, %12, %cst_13 {dimension_numbers = #tpu.dot_dimension_numbers<[1], [0], [0], [1], [0, 0, 1, 1], [], []>} : vector<8x1408xf32>, vector<1408x128xf32>, vector<8x128xf32> -> vector<8x128xf32>
      %c0_14 = arith.constant 0 : index
      %c0_15 = arith.constant 0 : index
      %14 = vector.load %arg4[%c0_14, %c0_15] : memref<1x128xf32, #tpu.memory_space<vmem>>, vector<1x128xf32>
      %15 = vector.broadcast %14 : vector<1x128xf32> to vector<8x128xf32>
      %16 = arith.addf %13, %15 : vector<8x128xf32>
      %cst_16 = arith.constant 0.000000e+00 : f32
      %17 = vector.broadcast %cst_16 : f32 to vector<8x128xf32>
      %18 = arith.maximumf %16, %17 : vector<8x128xf32>
      %c0_17 = arith.constant 0 : index
      %c0_18 = arith.constant 0 : index
      %19 = vector.load %arg5[%c0_17, %c0_18] : memref<128x128xf32, #tpu.memory_space<vmem>>, vector<128x128xf32>
      %cst_19 = arith.constant dense<0.000000e+00> : vector<8x128xf32>
      %20 = tpu.matmul %18, %19, %cst_19 {dimension_numbers = #tpu.dot_dimension_numbers<[1], [0], [0], [1], [0, 0, 1, 1], [], []>} : vector<8x128xf32>, vector<128x128xf32>, vector<8x128xf32> -> vector<8x128xf32>
      %c0_20 = arith.constant 0 : index
      %c0_21 = arith.constant 0 : index
      %21 = vector.load %arg6[%c0_20, %c0_21] : memref<1x128xf32, #tpu.memory_space<vmem>>, vector<1x128xf32>
      %22 = vector.broadcast %21 : vector<1x128xf32> to vector<8x128xf32>
      %23 = arith.addf %20, %22 : vector<8x128xf32>
      %cst_22 = arith.constant 0.000000e+00 : f32
      %24 = vector.broadcast %cst_22 : f32 to vector<8x128xf32>
      %25 = arith.maximumf %23, %24 : vector<8x128xf32>
      %c0_23 = arith.constant 0 : index
      %c0_24 = arith.constant 0 : index
      %26 = vector.load %arg7[%c0_23, %c0_24] : memref<128x128xf32, #tpu.memory_space<vmem>>, vector<128x128xf32>
      %cst_25 = arith.constant dense<0.000000e+00> : vector<8x128xf32>
      %27 = tpu.matmul %25, %26, %cst_25 {dimension_numbers = #tpu.dot_dimension_numbers<[1], [0], [0], [1], [0, 0, 1, 1], [], []>} : vector<8x128xf32>, vector<128x128xf32>, vector<8x128xf32> -> vector<8x128xf32>
      %c0_26 = arith.constant 0 : index
      %c0_27 = arith.constant 0 : index
      %28 = vector.load %arg8[%c0_26, %c0_27] : memref<1x128xf32, #tpu.memory_space<vmem>>, vector<1x128xf32>
      %29 = vector.broadcast %28 : vector<1x128xf32> to vector<8x128xf32>
      %30 = arith.addf %27, %29 : vector<8x128xf32>
      %c0_28 = arith.constant 0 : index
      %c0_29 = arith.constant 0 : index
      %31 = vector.load %arg9[%c0_28, %c0_29] : memref<8x128xf32, #tpu.memory_space<vmem>>, vector<8x128xf32>
      tpu.vector_store %arg9[%c0_28, %c0_29], %30 {strides = array<i32>} : memref<8x128xf32, #tpu.memory_space<vmem>>, vector<8x128xf32>,
    } else {
    }
    return
  }
  func.func @transform_0(%arg0: i32, %arg1: i32) -> (i32, i32, i32) {
    %c0_i32 = arith.constant 0 : i32
    %c0_i32_0 = arith.constant 0 : i32
    return %arg0, %arg1, %c0_i32 : i32, i32, i32
  }
  func.func @transform_1(%arg0: i32, %arg1: i32) -> (i32, i32) {
    %c0_i32 = arith.constant 0 : i32
    %c0_i32_0 = arith.constant 0 : i32
    %c0_i32_1 = arith.constant 0 : i32
    return %c0_i32, %c0_i32_0 : i32, i32
  }
  func.func @transform_2(%arg0: i32, %arg1: i32) -> (i32, i32) {
    %c0_i32 = arith.constant 0 : i32
    %c0_i32_0 = arith.constant 0 : i32
    %c0_i32_1 = arith.constant 0 : i32
    return %c0_i32, %c0_i32_0 : i32, i32
  }
  func.func @transform_3(%arg0: i32, %arg1: i32) -> (i32, i32) {
    %c0_i32 = arith.constant 0 : i32
    %c0_i32_0 = arith.constant 0 : i32
    %c0_i32_1 = arith.constant 0 : i32
    return %c0_i32, %c0_i32_0 : i32, i32
  }
  func.func @transform_4(%arg0: i32, %arg1: i32) -> (i32, i32) {
    %c0_i32 = arith.constant 0 : i32
    %c0_i32_0 = arith.constant 0 : i32
    %c0_i32_1 = arith.constant 0 : i32
    return %c0_i32, %c0_i32_0 : i32, i32
  }
  func.func @transform_5(%arg0: i32, %arg1: i32) -> (i32, i32) {
    %c0_i32 = arith.constant 0 : i32
    %c0_i32_0 = arith.constant 0 : i32
    %c0_i32_1 = arith.constant 0 : i32
    return %c0_i32, %c0_i32_0 : i32, i32
  }
  func.func @transform_6(%arg0: i32, %arg1: i32) -> (i32, i32) {
    %c0_i32 = arith.constant 0 : i32
    %c0_i32_0 = arith.constant 0 : i32
    %c0_i32_1 = arith.constant 0 : i32
    return %c0_i32, %c0_i32_0 : i32, i32
  }
  func.func @transform_7(%arg0: i32, %arg1: i32) -> (i32, i32) {
    %c0_i32 = arith.constant 0 : i32
    %c0_i32_0 = arith.constant 0 : i32
    return %arg0, %c0_i32 : i32, i32
  }
}

</mosaic_0001>

<bundles_post_ra>
// kernel: tpu_custom_call.1
= control target key start
LH: loop header
LB: loop body
LE: loop exit
PB: predicated region body
PF: predicated region fallthrough
CT: control target
= control target key end

     0   :  { %12 = vsyncpa [#allocation4], 0  ;;  %s3742_s0 = inlined_call_operand.hbm [shape: f32[8,32,1408], index: 0, kind: input, shape index: {}]   ;;  %s3743_s1 = inlined_call_operand.hbm [shape: f32[1408,128], index: 1, kind: input, shape index: {}]   ;;  %s3744_s2 = inlined_call_operand.hbm [shape: f32[1,128], index: 2, kind: input, shape index: {}]   ;;  %s3745_s3 = inlined_call_operand.hbm [shape: f32[128,128], index: 3, kind: input, shape index: {}]   ;;  %s3746_s4 = inlined_call_operand.hbm [shape: f32[1,128], index: 4, kind: input, shape index: {}]   ;;  %s3747_s5 = inlined_call_operand.hbm [shape: f32[128,128], index: 5, kind: input, shape index: {}]   ;;  %s3748_s6 = inlined_call_operand.hbm [shape: f32[1,128], index: 6, kind: input, shape index: {}]   ;;  %s3749_s7 = inlined_call_operand.hbm [shape: f32[8,128], index: 7, kind: output, shape index: {}]  }
   0x1   :  { %13 = vsyncpa [#allocation7], 0 }
   0x2   :  { %14 = vsyncpa [#allocation10], 0 }
   0x3   :  { %15 = vsyncpa [#allocation13], 0 }
   0x4   :  { %16 = vsyncpa [#allocation5], 0  ;;  %s3082_s24 = smov [#allocation6]   ;;  %s2896_s28 = scalar_lea.hbm %s3743_s1, 22528 }
   0x5   :  { %s34_s25 = sshll.u32 %s3082_s24, 4  ;;  %p2897_p0 = scmp.ne.s32.totalorder %s3743_s1, %s2896_s28  ;;  %s35_s25 = int_to_ptr.vmem [resolvable:$true] %s34_s25 }
   0x6   :  { %p2900_p1 = scmp.lt.u32.totalorder %s2896_s28, %s3743_s1 }
   0x8   :  { %p2902_p2 = pnand %p2900_p1, %p2897_p0 }
   0xa   :  { %2905 = shalt.err (!%p2902_p2)
}
   0xb   :  { %s2906_s10 = scalar_lea.vmem %s35_s25, 22528  ;;  %p2911_p4 = scmp.lt.s32.totalorder %s35_s25, %s35_s25 }
   0xc   :  { %p2907_p3 = scmp.ne.s32.totalorder %s35_s25, %s2906_s10  ;;  %p2912_p5 = scmp.lt.s32.totalorder %s2906_s10, %s2906_s10 }
   0xe   :  { %p2913_p6 = por %p2912_p5, %p2911_p4 }
  0x10   :  { %p2914_p7 = pnand %p2913_p6, %p2907_p3 }
  0x12   :  { %2917 = shalt.err (!%p2914_p7)
}
  0x13   :  { %s3083_s11 = smov 128   ;;  %s3084_s12 = smov 8  }
  0x14   :  { %40 = dma.hbm_to_vmem [thread:$0]  %s3743_s1, 22528, %s35_s25, [#allocation7], %s3083_s11, %s3083_s11, %s3084_s12  }
  0x15   :  { %s3085_s15 = smov [#allocation9]   ;;  %s3086_s17 = smov [#allocation12]  }
  0x16   :  { %s56_s16 = sshll.u32 %s3085_s15, 4  ;;  %s78_s18 = sshll.u32 %s3086_s17, 4  ;;  %s57_s16 = int_to_ptr.vmem [resolvable:$true] %s56_s16  ;;  %s79_s18 = int_to_ptr.vmem [resolvable:$true] %s78_s18 }
  0x17   :  { %s2918_s21 = scalar_lea.hbm %s3745_s3, 2048 }
  0x18   :  { %p2919_p8 = scmp.ne.s32.totalorder %s3745_s3, %s2918_s21  ;;  %p2922_p9 = scmp.lt.u32.totalorder %s2918_s21, %s3745_s3 }
  0x1a   :  { %p2924_p10 = pnand %p2922_p9, %p2919_p8 }
  0x1c   :  { %2927 = shalt.err (!%p2924_p10)
}
  0x1d   :  { %s2928_s1 = scalar_lea.vmem %s57_s16, 2048  ;;  %p2933_p12 = scmp.lt.s32.totalorder %s57_s16, %s57_s16 }
  0x1e   :  { %p2929_p11 = scmp.ne.s32.totalorder %s57_s16, %s2928_s1  ;;  %p2934_p13 = scmp.lt.s32.totalorder %s2928_s1, %s2928_s1 }
  0x20   :  { %p2935_p0 = por %p2934_p13, %p2933_p12 }
  0x22   :  { %p2936_p1 = pnand %p2935_p0, %p2929_p11 }
  0x24   :  { %2939 = shalt.err (!%p2936_p1)
}
  0x25   :  { %62 = dma.hbm_to_vmem [thread:$0]  %s3745_s3, 2048, %s57_s16, [#allocation10], %s3083_s11, %s3083_s11, %s3084_s12  }
  0x26   :  { %s2940_s30 = scalar_lea.hbm %s3747_s5, 2048 }
  0x27   :  { %p2941_p2 = scmp.ne.s32.totalorder %s3747_s5, %s2940_s30  ;;  %p2944_p3 = scmp.lt.u32.totalorder %s2940_s30, %s3747_s5 }
  0x29   :  { %p2946_p4 = pnand %p2944_p3, %p2941_p2 }
  0x2b   :  { %2949 = shalt.err (!%p2946_p4)
}
  0x2c   :  { %s2950_s14 = scalar_lea.vmem %s79_s18, 2048  ;;  %p2955_p6 = scmp.lt.s32.totalorder %s79_s18, %s79_s18 }
  0x2d   :  { %p2951_p5 = scmp.ne.s32.totalorder %s79_s18, %s2950_s14  ;;  %p2956_p7 = scmp.lt.s32.totalorder %s2950_s14, %s2950_s14 }
  0x2f   :  { %p2957_p8 = por %p2956_p7, %p2955_p6 }
  0x31   :  { %p2958_p9 = pnand %p2957_p8, %p2951_p5 }
  0x33   :  { %2961 = shalt.err (!%p2958_p9)
}
  0x34   :  { %84 = dma.hbm_to_vmem [thread:$0]  %s3747_s5, 2048, %s79_s18, [#allocation13], %s3083_s11, %s3083_s11, %s3084_s12  }
  0x35   :  { %s3087_s16 = smov [#allocation3]   ;;  %s2962_s21 = scalar_lea.hbm %s3742_s0, 45056 }
  0x36   :  { %s22_s17 = sshll.u32 %s3087_s16, 4  ;;  %p2963_p10 = scmp.ne.s32.totalorder %s3742_s0, %s2962_s21  ;;  %s23_s17 = int_to_ptr.vmem [resolvable:$true] %s22_s17 }
  0x37   :  { %p2966_p11 = scmp.lt.u32.totalorder %s2962_s21, %s3742_s0 }
  0x39   :  { %p2968_p12 = pnand %p2966_p11, %p2963_p10 }
  0x3b   :  { %2971 = shalt.err (!%p2968_p12)
}
  0x3c   :  { %s2972_s1 = scalar_lea.vmem %s23_s17, 45056  ;;  %p2977_p0 = scmp.lt.s32.totalorder %s23_s17, %s23_s17 }
  0x3d   :  { %p2973_p13 = scmp.ne.s32.totalorder %s23_s17, %s2972_s1  ;;  %p2978_p1 = scmp.lt.s32.totalorder %s2972_s1, %s2972_s1 }
  0x3f   :  { %p2979_p2 = por %p2978_p1, %p2977_p0 }
  0x41   :  { %p2980_p3 = pnand %p2979_p2, %p2973_p13 }
  0x43   :  { %2983 = shalt.err (!%p2980_p3)
}
  0x44   :  { %s3088_s5 = smov 1408   ;;  %s3089_s11 = smov 88  }
  0x45   :  { %28 = dma.hbm_to_vmem [thread:$0]  %s3742_s0, 45056, %s23_s17, [#allocation4], %s3088_s5, %s3088_s5, %s3089_s11  }
  0x46   :  { %s3090_s25 = smov [#allocation8]   ;;  %s3091_s28 = smov [#allocation11]  }
  0x47   :  { %s47_s27 = sshll.u32 %s3090_s25, 4  ;;  %s69_s29 = sshll.u32 %s3091_s28, 4  ;;  %s48_s27 = int_to_ptr.vmem [resolvable:$true] %s47_s27  ;;  %s70_s29 = int_to_ptr.vmem [resolvable:$true] %s69_s29 }
  0x48   :  { %s2984_s9 = scalar_lea.hbm %s3744_s2, 16 }
  0x49   :  { %p2985_p4 = scmp.ne.s32.totalorder %s3744_s2, %s2984_s9  ;;  %p2988_p5 = scmp.lt.u32.totalorder %s2984_s9, %s3744_s2 }
  0x4b   :  { %p2990_p6 = pnand %p2988_p5, %p2985_p4 }
  0x4d   :  { %2993 = shalt.err (!%p2990_p6)
}
  0x4e   :  { %s2994_s0 = scalar_lea.vmem %s48_s27, 16  ;;  %s2998_s15 = scalar_lea.vmem %s48_s27, 32 }
  0x4f   :  { %p2995_p7 = scmp.ne.s32.totalorder %s48_s27, %s2994_s0  ;;  %p2999_p8 = scmp.lt.s32.totalorder %s48_s27, %s48_s27 }
  0x50   :  { %p3000_p9 = scmp.lt.s32.totalorder %s2998_s15, %s2994_s0 }
  0x52   :  { %p3001_p10 = por %p3000_p9, %p2999_p8 }
  0x54   :  { %p3002_p11 = pnand %p3001_p10, %p2995_p7 }
  0x56   :  { %3005 = shalt.err (!%p3002_p11)
}
  0x57   :  { %50 = dma.hbm_to_vmem [thread:$0]  %s3744_s2, 16, %s48_s27, [#allocation7]  }
  0x58   :  { %s3006_s21 = scalar_lea.hbm %s3746_s4, 16 }
  0x59   :  { %p3007_p12 = scmp.ne.s32.totalorder %s3746_s4, %s3006_s21  ;;  %p3010_p13 = scmp.lt.u32.totalorder %s3006_s21, %s3746_s4 }
  0x5b   :  { %p3012_p0 = pnand %p3010_p13, %p3007_p12 }
  0x5d   :  { %3015 = shalt.err (!%p3012_p0)
}
  0x5e   :  { %s3016_s1 = scalar_lea.vmem %s70_s29, 16  ;;  %s3020_s5 = scalar_lea.vmem %s70_s29, 32 }
  0x5f   :  { %p3017_p1 = scmp.ne.s32.totalorder %s70_s29, %s3016_s1  ;;  %p3021_p2 = scmp.lt.s32.totalorder %s70_s29, %s70_s29 }
  0x60   :  { %p3022_p3 = scmp.lt.s32.totalorder %s3020_s5, %s3016_s1 }
  0x62   :  { %p3023_p4 = por %p3022_p3, %p3021_p2 }
  0x64   :  { %p3024_p5 = pnand %p3023_p4, %p3017_p1 }
  0x66   :  { %3027 = shalt.err (!%p3024_p5)
}
  0x67   :  { %72 = dma.hbm_to_vmem [thread:$0]  %s3746_s4, 16, %s70_s29, [#allocation10]  }
  0x68   :  { %s3092_s12 = smov [#allocation14]   ;;  %s3028_s28 = scalar_lea.hbm %s3748_s6, 16 }
  0x69   :  { %s91_s18 = sshll.u32 %s3092_s12, 4  ;;  %p3029_p6 = scmp.ne.s32.totalorder %s3748_s6, %s3028_s28  ;;  %s92_s18 = int_to_ptr.vmem [resolvable:$true] %s91_s18 }
  0x6a   :  { %p3032_p7 = scmp.lt.u32.totalorder %s3028_s28, %s3748_s6 }
  0x6c   :  { %p3034_p8 = pnand %p3032_p7, %p3029_p6 }
  0x6e   :  { %3037 = shalt.err (!%p3034_p8)
}
  0x6f   :  { %s3038_s13 = scalar_lea.vmem %s92_s18, 16  ;;  %s3042_s4 = scalar_lea.vmem %s92_s18, 32 }
  0x70   :  { %p3039_p9 = scmp.ne.s32.totalorder %s92_s18, %s3038_s13  ;;  %p3043_p10 = scmp.lt.s32.totalorder %s92_s18, %s92_s18 }
  0x71   :  { %p3044_p11 = scmp.lt.s32.totalorder %s3042_s4, %s3038_s13 }
  0x73   :  { %p3045_p12 = por %p3044_p11, %p3043_p10 }
  0x75   :  { %p3046_p13 = pnand %p3045_p12, %p3039_p9 }
  0x77   :  { %3049 = shalt.err (!%p3046_p13)
}
  0x78   :  { %94 = dma.hbm_to_vmem [thread:$0]  %s3748_s6, 16, %s92_s18, [#allocation13]  }
  0x79   :  { %3072 = dma.done.wait [#allocation4], 45056  }
  0x7a   :  { %3073 = vsyncadd [#allocation4], 4294922240 }
  0x7b   :  { %3074 = dma.done.wait [#allocation7], 22544  }
  0x7c   :  { %3075 = vsyncadd [#allocation7], 4294944752 }
  0x7d   :  { %3076 = dma.done.wait [#allocation10], 2064  }
  0x7e   :  { %3077 = vsyncadd [#allocation10], 4294965232 }
  0x7f   :  { %3078 = dma.done.wait [#allocation13], 2064  }
  0x80   :  { %3079 = vsyncadd [#allocation13], 4294965232  ;;  %v1521_v0 = vld [vmem:[#allocation6 + $0x80] sm:$0xff]  ;;  %v1522_v1 = vld [vmem:[#allocation6 + $0x88] sm:$0xff]  ;;  %vm1374_vm0 = vcmask 1041409   ;;  %vm1376_vm1 = vcmask 1042434  }
  0x81   :  { %v1505_v2 = vld [vmem:[#allocation6] sm:$0xff]  ;;  %v2649_v3 = vpack.c.bf16 %v1522_v1, %v1521_v0  ;;  %v1506_v4 = vld [vmem:[#allocation6 + $0x8] sm:$0xff]  ;;  %v1523_v11 = vld [vmem:[#allocation6 + $0x90] sm:$0xff]  ;;  %vm1378_vm2 = vcmask 1043459   ;;  %vm1380_vm3 = vcmask 1044484   ;;  %vm1382_vm4 = vcmask 1045509  }
  0x82   :  { %v1553_v5 = vld [vmem:[#allocation6 + $0x180] sm:$0xff]  ;;  %v1554_v6 = vld [vmem:[#allocation6 + $0x188] sm:$0xff]  ;;  %v2651_v7 = vpack.c.bf16 %v1506_v4, %v1505_v2  ;;  %v1524_v13 = vld [vmem:[#allocation6 + $0x98] sm:$0xff]  ;;  %vm1384_vm5 = vcmask 1046534   ;;  %vm1386_vm6 = vcmask 1047559   ;;  %vm3094_vm7 = vmmov 0  }
  0x83   :  { %v2681_v8 = vpack.c.bf16 %v1554_v6, %v1553_v5  ;;  %v1537_v9 = vld [vmem:[#allocation6 + $0x100] sm:$0xff]  ;;  %v1538_v10 = vld [vmem:[#allocation6 + $0x108] sm:$0xff]  ;;  %2650 = vmatprep.subr.bf16.mxu0 %v2649_v3  ;;  %v1507_v14 = vld [vmem:[#allocation6 + $0x10] sm:$0xff]  ;;  %v2653_v16 = vpack.c.bf16 %v1524_v13, %v1523_v11  ;;  %s3096_s6 = smov [#allocation15]  }
  0x84   :  { %v2683_v12 = vpack.c.bf16 %v1538_v10, %v1537_v9  ;;  %v1508_v15 = vld [vmem:[#allocation6 + $0x18] sm:$0xff]  ;;  %2652 = vmatpush3.bf16.msra.mxu0 %v2651_v7  ;;  %v1555_v18 = vld [vmem:[#allocation6 + $0x190] sm:$0xff]  ;;  %v1525_v23 = vld [vmem:[#allocation6 + $0xa0] sm:$0xff]  ;;  %s2303_s3 = sshll.u32 %s3096_s6, 4  ;;  %s2304_s3 = int_to_ptr.vmem [resolvable:$true] %s2303_s3 }
  0x85   :  { %2682 = vmatprep.subr.bf16.mxu1 %v2681_v8  ;;  %v2655_v17 = vpack.c.bf16 %v1508_v15, %v1507_v14  ;;  %v1556_v19 = vld [vmem:[#allocation6 + $0x198] sm:$0xff]  ;;  %v1539_v20 = vld [vmem:[#allocation6 + $0x110] sm:$0xff]  ;;  %v1526_v24 = vld [vmem:[#allocation6 + $0xa8] sm:$0xff]  ;;  %2654 = vmatprep.subr.bf16.mxu0 %v2653_v16  ;;  %s3050_s0 = scalar_lea.vmem %s2304_s3, 128  ;;  %p3055_p1 = scmp.lt.s32.totalorder %s2304_s3, %s2304_s3 }
  0x86   :  { %2684 = vmatpush3.bf16.msra.mxu1 %v2683_v12  ;;  %v2685_v21 = vpack.c.bf16 %v1556_v19, %v1555_v18  ;;  %v1540_v22 = vld [vmem:[#allocation6 + $0x118] sm:$0xff]  ;;  %v2657_v26 = vpack.c.bf16 %v1526_v24, %v1525_v23  ;;  %v1509_v27 = vld [vmem:[#allocation6 + $0x20] sm:$0xff]  ;;  %v1510_v28 = vld [vmem:[#allocation6 + $0x28] sm:$0xff]  ;;  %p3051_p0 = scmp.ne.s32.totalorder %s2304_s3, %s3050_s0  ;;  %p3056_p2 = scmp.lt.s32.totalorder %s3050_s0, %s3050_s0 }
  0x87   :  { %v2687_v25 = vpack.c.bf16 %v1540_v22, %v1539_v20  ;;  %v1557_v29 = vld [vmem:[#allocation6 + $0x1a0] sm:$0xff]  ;;  %v1558_v30 = vld [vmem:[#allocation6 + $0x1a8] sm:$0xff]  ;;  %v2659_v33 = vpack.c.bf16 %v1510_v28, %v1509_v27  ;;  %v1527_v35 = vld [vmem:[#allocation6 + $0xb0] sm:$0xff] }
  0x88   :  { %2686 = vmatprep.subr.bf16.mxu1 %v2685_v21  ;;  %v1541_v31 = vld [vmem:[#allocation6 + $0x120] sm:$0xff]  ;;  %v1542_v32 = vld [vmem:[#allocation6 + $0x128] sm:$0xff]  ;;  %2656 = vmatpush3.bf16.msra.mxu0 %v2655_v17  ;;  %v2689_v34 = vpack.c.bf16 %v1558_v30, %v1557_v29  ;;  %v1528_v36 = vld [vmem:[#allocation6 + $0xb8] sm:$0xff]  ;;  %p3057_p3 = por %p3056_p2, %p3055_p1 }
  0x89   :  { %v1511_v37 = vld [vmem:[#allocation6 + $0x30] sm:$0xff]  ;;  %2658 = vmatprep.subr.bf16.mxu0 %v2657_v26  ;;  %v2691_v38 = vpack.c.bf16 %v1542_v32, %v1541_v31  ;;  %v2661_v39 = vpack.c.bf16 %v1528_v36, %v1527_v35  ;;  %v1512_v40 = vld [vmem:[#allocation6 + $0x38] sm:$0xff]  ;;  %v1529_v46 = vld [vmem:[#allocation6 + $0xc0] sm:$0xff] }
  0x8a   :  { %2688 = vmatpush3.bf16.msra.mxu1 %v2687_v25  ;;  %v1559_v41 = vld [vmem:[#allocation6 + $0x1b0] sm:$0xff]  ;;  %v1560_v42 = vld [vmem:[#allocation6 + $0x1b8] sm:$0xff]  ;;  %v1530_v47 = vld [vmem:[#allocation6 + $0xc8] sm:$0xff]  ;;  %v2663_v48 = vpack.c.bf16 %v1512_v40, %v1511_v37  ;;  %p3058_p4 = pnand %p3057_p3, %p3051_p0 }
  0x8b   :  { %2690 = vmatprep.subr.bf16.mxu1 %v2689_v34  ;;  %v2693_v43 = vpack.c.bf16 %v1560_v42, %v1559_v41  ;;  %v1543_v44 = vld [vmem:[#allocation6 + $0x130] sm:$0xff]  ;;  %v1544_v45 = vld [vmem:[#allocation6 + $0x138] sm:$0xff]  ;;  %v1561_v49 = vld [vmem:[#allocation6 + $0x1c0] sm:$0xff]  ;;  %v2665_v52 = vpack.c.bf16 %v1530_v47, %v1529_v46 }
  0x8c   :  { %2660 = vmatpush3.bf16.msra.mxu0 %v2659_v33  ;;  %v1562_v50 = vld [vmem:[#allocation6 + $0x1c8] sm:$0xff]  ;;  %v2695_v51 = vpack.c.bf16 %v1544_v45, %v1543_v44  ;;  %v1513_v53 = vld [vmem:[#allocation6 + $0x40] sm:$0xff]  ;;  %v1531_v58 = vld [vmem:[#allocation6 + $0xd0] sm:$0xff] }
  0x8d   :  { %2662 = vmatprep.subr.bf16.mxu0 %v2661_v39  ;;  %v1514_v54 = vld [vmem:[#allocation6 + $0x48] sm:$0xff]  ;;  %v1545_v55 = vld [vmem:[#allocation6 + $0x140] sm:$0xff]  ;;  %v2697_v56 = vpack.c.bf16 %v1562_v50, %v1561_v49  ;;  %v1532_v59 = vld [vmem:[#allocation6 + $0xd8] sm:$0xff] }
  0x8e   :  { %2692 = vmatpush3.bf16.msra.mxu1 %v2691_v38  ;;  %v1546_v57 = vld [vmem:[#allocation6 + $0x148] sm:$0xff]  ;;  %v1563_v60 = vld [vmem:[#allocation6 + $0x1d0] sm:$0xff]  ;;  %v1564_v61 = vld [vmem:[#allocation6 + $0x1d8] sm:$0xff]  ;;  %v2667_v62 = vpack.c.bf16 %v1514_v54, %v1513_v53  ;;  %v2669_v0 = vpack.c.bf16 %v1532_v59, %v1531_v58 }
  0x8f   :  { %2694 = vmatprep.subr.bf16.mxu1 %v2693_v43  ;;  %v2699_v63 = vpack.c.bf16 %v1546_v57, %v1545_v55  ;;  %v1515_v1 = vld [vmem:[#allocation6 + $0x50] sm:$0xff]  ;;  %v1516_v2 = vld [vmem:[#allocation6 + $0x58] sm:$0xff]  ;;  %v2701_v4 = vpack.c.bf16 %v1564_v61, %v1563_v60  ;;  %v1533_v6 = vld [vmem:[#allocation6 + $0xe0] sm:$0xff] }
  0x90   :  { %2664 = vmatpush3.bf16.msra.mxu0 %v2663_v48  ;;  %v1547_v3 = vld [vmem:[#allocation6 + $0x150] sm:$0xff]  ;;  %v1548_v5 = vld [vmem:[#allocation6 + $0x158] sm:$0xff]  ;;  %v1534_v7 = vld [vmem:[#allocation6 + $0xe8] sm:$0xff]  ;;  %v2671_v12 = vpack.c.bf16 %v1516_v2, %v1515_v1 }
  0x91   :  { %2666 = vmatprep.subr.bf16.mxu0 %v2665_v52  ;;  %v1517_v8 = vld [vmem:[#allocation6 + $0x60] sm:$0xff]  ;;  %v1518_v9 = vld [vmem:[#allocation6 + $0x68] sm:$0xff]  ;;  %v1535_v15 = vld [vmem:[#allocation6 + $0xf0] sm:$0xff]  ;;  %v2703_v18 = vpack.c.bf16 %v1548_v5, %v1547_v3  ;;  %v2673_v19 = vpack.c.bf16 %v1534_v7, %v1533_v6 }
  0x92   :  { %2696 = vmatpush3.bf16.msra.mxu1 %v2695_v51  ;;  %v1565_v10 = vld [vmem:[#allocation6 + $0x1e0] sm:$0xff]  ;;  %v1566_v11 = vld [vmem:[#allocation6 + $0x1e8] sm:$0xff]  ;;  %v1536_v16 = vld [vmem:[#allocation6 + $0xf8] sm:$0xff]  ;;  %v2675_v35 = vpack.c.bf16 %v1518_v9, %v1517_v8 }
  0x93   :  { %2698 = vmatprep.subr.bf16.mxu1 %v2697_v56  ;;  %v1549_v13 = vld [vmem:[#allocation6 + $0x160] sm:$0xff]  ;;  %v1550_v14 = vld [vmem:[#allocation6 + $0x168] sm:$0xff]  ;;  %v1567_v20 = vld [vmem:[#allocation6 + $0x1f0] sm:$0xff]  ;;  %v2705_v24 = vpack.c.bf16 %v1566_v11, %v1565_v10  ;;  %v2677_v42 = vpack.c.bf16 %v1536_v16, %v1535_v15 }
  0x94   :  { %2668 = vmatpush3.bf16.msra.mxu0 %v2667_v62  ;;  %v132_v17 = vld [vmem:[#allocation3 + $0x8] sm:$0xff]  ;;  %v1568_v21 = vld [vmem:[#allocation6 + $0x1f8] sm:$0xff]  ;;  %v143_v22 = vld [vmem:[#allocation3 + $0x60] sm:$0xff]  ;;  %v2707_v41 = vpack.c.bf16 %v1550_v14, %v1549_v13 }
  0x95   :  { %2670 = vmatprep.subr.bf16.mxu0 %v2669_v0  ;;  %v154_v23 = vld [vmem:[#allocation3 + $0xb8] sm:$0xff]  ;;  %v3230_v25 = vld [vmem:[#allocation6 + $0x70] sm:$0xff]  ;;  %v176_v27 = vld [vmem:[#allocation3 + $0x168] sm:$0xff]  ;;  %v503_v30 = vadd.f32 %v143_v22, %v132_v17  ;;  %v2709_v47 = vpack.c.bf16 %v1568_v21, %v1567_v20 }
  0x96   :  { %2700 = vmatpush3.bf16.msra.mxu1 %v2699_v63  ;;  %v3232_v26 = vld [vmem:[#allocation6 + $0x78] sm:$0xff]  ;;  %v187_v28 = vld [vmem:[#allocation3 + $0x1c0] sm:$0xff]  ;;  %v165_v31 = vld [vmem:[#allocation3 + $0x110] sm:$0xff] }
  0x97   :  { %2702 = vmatprep.subr.bf16.mxu1 %v2701_v4  ;;  %v198_v29 = vld [vmem:[#allocation3 + $0x218] sm:$0xff]  ;;  %v220_v32 = vld [vmem:[#allocation3 + $0x2c8] sm:$0xff]  ;;  %v231_v33 = vld [vmem:[#allocation3 + $0x320] sm:$0xff]  ;;  %v602_v34 = vadd.f32 %v187_v28, %v176_v27  ;;  %v504_v39 = vadd.f32 %v503_v30, %v154_v23  ;;  %v2679_v54 = vpack.c.bf16 %v3232_v26, %v3230_v25 }
  0x98   :  { %2672 = vmatpush3.bf16.msra.mxu0 %v2671_v12  ;;  %v209_v36 = vld [vmem:[#allocation3 + $0x270] sm:$0xff]  ;;  %v242_v37 = vld [vmem:[#allocation3 + $0x378] sm:$0xff]  ;;  %v264_v38 = vld [vmem:[#allocation3 + $0x428] sm:$0xff]  ;;  %v701_v40 = vadd.f32 %v231_v33, %v220_v32 }
  0x99   :  { %2674 = vmatprep.subr.bf16.mxu0 %v2673_v19  ;;  %v253_v43 = vld [vmem:[#allocation3 + $0x3d0] sm:$0xff]  ;;  %v275_v44 = vld [vmem:[#allocation3 + $0x480] sm:$0xff]  ;;  %v286_v45 = vld [vmem:[#allocation3 + $0x4d8] sm:$0xff]  ;;  %v603_v46 = vadd.f32 %v602_v34, %v198_v29  ;;  %v505_v51 = vadd.f32 %v504_v39, %v165_v31 }
  0x9a   :  { %2704 = vmatpush3.bf16.msra.mxu1 %v2703_v18  ;;  %v308_v48 = vld [vmem:[#allocation3 + $0x588] sm:$0xff]  ;;  %v319_v49 = vld [vmem:[#allocation3 + $0x5e0] sm:$0xff]  ;;  %v330_v50 = vld [vmem:[#allocation3 + $0x638] sm:$0xff]  ;;  %v702_v52 = vadd.f32 %v701_v40, %v242_v37  ;;  %v800_v53 = vadd.f32 %v275_v44, %v264_v38 }
  0x9b   :  { %2706 = vmatprep.subr.bf16.mxu1 %v2705_v24  ;;  %v297_v55 = vld [vmem:[#allocation3 + $0x530] sm:$0xff]  ;;  %v352_v56 = vld [vmem:[#allocation3 + $0x6e8] sm:$0xff]  ;;  %v363_v57 = vld [vmem:[#allocation3 + $0x740] sm:$0xff]  ;;  %v604_v58 = vadd.f32 %v603_v46, %v209_v36  ;;  %v899_v59 = vadd.f32 %v319_v49, %v308_v48  ;;  %v506_v63 = vrot.slane %v505_v51, 4 }
  0x9c   :  { %2676 = vmatpush3.bf16.msra.mxu0 %v2675_v35  ;;  %v341_v60 = vld [vmem:[#allocation3 + $0x690] sm:$0xff]  ;;  %v374_v61 = vld [vmem:[#allocation3 + $0x798] sm:$0xff]  ;;  %v396_v62 = vld [vmem:[#allocation3 + $0x848] sm:$0xff]  ;;  %v703_v0 = vadd.f32 %v702_v52, %v253_v43  ;;  %v801_v1 = vadd.f32 %v800_v53, %v286_v45  ;;  %v998_v2 = vadd.f32 %v363_v57, %v352_v56 }
  0x9d   :  { %2678 = vmatprep.subr.bf16.mxu0 %v2677_v42  ;;  %v385_v3 = vld [vmem:[#allocation3 + $0x7f0] sm:$0xff]  ;;  %v407_v4 = vld [vmem:[#allocation3 + $0x8a0] sm:$0xff]  ;;  %v418_v5 = vld [vmem:[#allocation3 + $0x8f8] sm:$0xff]  ;;  %v605_v6 = vrot.slane %v604_v58, 4  ;;  %v900_v7 = vadd.f32 %v899_v59, %v330_v50  ;;  %v507_v11 = vadd.f32 %v506_v63, %v505_v51 }
  0x9e   :  { %2708 = vmatpush3.bf16.msra.mxu1 %v2707_v41  ;;  %v440_v8 = vld [vmem:[#allocation3 + $0x9a8] sm:$0xff]  ;;  %v451_v9 = vld [vmem:[#allocation3 + $0xa00] sm:$0xff]  ;;  %v462_v10 = vld [vmem:[#allocation3 + $0xa58] sm:$0xff]  ;;  %v704_v12 = vrot.slane %v703_v0, 4  ;;  %v802_v13 = vadd.f32 %v801_v1, %v297_v55  ;;  %v999_v14 = vadd.f32 %v998_v2, %v374_v61  ;;  %v1097_v17 = vadd.f32 %v407_v4, %v396_v62 }
  0x9f   :  { %2710 = vmatprep.subr.bf16.mxu1 %v2709_v47  ;;  %v606_v15 = vadd.f32 %v605_v6, %v604_v58  ;;  %v901_v16 = vadd.f32 %v900_v7, %v341_v60  ;;  %v1196_v18 = vadd.f32 %v451_v9, %v440_v8  ;;  %v429_v19 = vld [vmem:[#allocation3 + $0x950] sm:$0xff]  ;;  %v508_v21 = vrot.slane %v507_v11, 2  ;;  %v1552_v46 = vld [vmem:[#allocation6 + $0x178] sm:$0xff]  ;;  %v131_v55 = vld [vmem:[#allocation3] sm:$0xff] }
  0xa0   :  { %2680 = vmatpush3.bf16.msra.mxu0 %v2679_v54  ;;  %v473_v20 = vld [vmem:[#allocation3 + $0xab0] sm:$0xff]  ;;  %v705_v22 = vadd.f32 %v704_v12, %v703_v0  ;;  %v803_v23 = vrot.slane %v802_v13, 4  ;;  %v1000_v24 = vadd.f32 %v999_v14, %v385_v3  ;;  %v1098_v27 = vadd.f32 %v1097_v17, %v418_v5  ;;  %v142_v56 = vld [vmem:[#allocation3 + $0x58] sm:$0xff]  ;;  %v175_v61 = vld [vmem:[#allocation3 + $0x160] sm:$0xff] }
  0xa1   :  { %v607_v25 = vrot.slane %v606_v15, 2  ;;  %v902_v26 = vrot.slane %v901_v16, 4  ;;  %v1197_v28 = vadd.f32 %v1196_v18, %v462_v10  ;;  %v509_v29 = vadd.f32 %v508_v21, %v507_v11  ;;  %v1551_v45 = vld [vmem:[#allocation6 + $0x170] sm:$0xff]  ;;  %v186_v62 = vld [vmem:[#allocation3 + $0x1b8] sm:$0xff]  ;;  %v219_v4 = vld [vmem:[#allocation3 + $0x2c0] sm:$0xff] }
  0xa2   :  { %v706_v30 = vrot.slane %v705_v22, 2  ;;  %v804_v31 = vadd.f32 %v803_v23, %v802_v13  ;;  %v1001_v32 = vrot.slane %v1000_v24, 4  ;;  %v1099_v35 = vadd.f32 %v1098_v27, %v429_v19  ;;  %v153_v3 = vld [vmem:[#allocation3 + $0xb0] sm:$0xff]  ;;  %v230_v5 = vld [vmem:[#allocation3 + $0x318] sm:$0xff]  ;;  %v164_v9 = vld [vmem:[#allocation3 + $0x108] sm:$0xff] }
  0xa3   :  { %v608_v33 = vadd.f32 %v607_v25, %v606_v15  ;;  %v903_v34 = vadd.f32 %v902_v26, %v901_v16  ;;  %v1198_v36 = vadd.f32 %v1197_v28, %v473_v20  ;;  %v510_v37 = vrot.slane %v509_v29, 1  ;;  %v197_v10 = vld [vmem:[#allocation3 + $0x210] sm:$0xff]  ;;  %v208_v11 = vld [vmem:[#allocation3 + $0x268] sm:$0xff]  ;;  %v263_v17 = vld [vmem:[#allocation3 + $0x420] sm:$0xff] }
  0xa4   :  { %v707_v38 = vadd.f32 %v706_v30, %v705_v22  ;;  %v805_v39 = vrot.slane %v804_v31, 2  ;;  %v1002_v40 = vadd.f32 %v1001_v32, %v1000_v24  ;;  %v1100_v43 = vrot.slane %v1099_v35, 4  ;;  %v241_v16 = vld [vmem:[#allocation3 + $0x370] sm:$0xff]  ;;  %v274_v18 = vld [vmem:[#allocation3 + $0x478] sm:$0xff]  ;;  %v252_v22 = vld [vmem:[#allocation3 + $0x3c8] sm:$0xff] }
  0xa5   :  { %v609_v41 = vrot.slane %v608_v33, 1  ;;  %v904_v42 = vrot.slane %v903_v34, 2  ;;  %v1199_v44 = vrot.slane %v1198_v36, 4  ;;  %v511_v47 = vadd.f32 %v510_v37, %v509_v29  ;;  %v307_v23 = vld [vmem:[#allocation3 + $0x580] sm:$0xff]  ;;  %v318_v24 = vld [vmem:[#allocation3 + $0x5d8] sm:$0xff]  ;;  %v285_v30 = vld [vmem:[#allocation3 + $0x4d0] sm:$0xff] }
  0xa6   :  { %v708_v48 = vrot.slane %v707_v38, 1  ;;  %v806_v49 = vadd.f32 %v805_v39, %v804_v31  ;;  %v1003_v50 = vrot.slane %v1002_v40, 2  ;;  %v1101_v53 = vadd.f32 %v1100_v43, %v1099_v35  ;;  %v351_v31 = vld [vmem:[#allocation3 + $0x6e0] sm:$0xff]  ;;  %v362_v32 = vld [vmem:[#allocation3 + $0x738] sm:$0xff]  ;;  %v329_v35 = vld [vmem:[#allocation3 + $0x630] sm:$0xff] }
  0xa7   :  { %v610_v51 = vadd.f32 %v609_v41, %v608_v33  ;;  %v905_v52 = vadd.f32 %v904_v42, %v903_v34  ;;  %v1200_v54 = vadd.f32 %v1199_v44, %v1198_v36  ;;  %v2711_v60 = vpack.c.bf16 %v1552_v46, %v1551_v45  ;;  %v395_v36 = vld [vmem:[#allocation3 + $0x840] sm:$0xff]  ;;  %v406_v37 = vld [vmem:[#allocation3 + $0x898] sm:$0xff]  ;;  %v296_v43 = vld [vmem:[#allocation3 + $0x528] sm:$0xff] }
  0xa8   :  { %v709_v57 = vadd.f32 %v708_v48, %v707_v38  ;;  %v807_v58 = vrot.slane %v806_v49, 1  ;;  %v1004_v59 = vadd.f32 %v1003_v50, %v1002_v40  ;;  %v1102_v0 = vrot.slane %v1101_v53, 2  ;;  %v340_v46 = vld [vmem:[#allocation3 + $0x688] sm:$0xff]  ;;  %v417_v48 = vld [vmem:[#allocation3 + $0x8f0] sm:$0xff] }
  0xa9   :  { %v906_v63 = vrot.slane %v905_v52, 1  ;;  %v1201_v1 = vrot.slane %v1200_v54, 2  ;;  %v1388_v2 = vsel %vm1374_vm0, %v610_v51, %v511_v47  ;;  %2712 = vmatpush3.bf16.msra.mxu1 %v2711_v60  ;;  %v494_v12 = vadd.f32 %v142_v56, %v131_v55  ;;  %v373_v47 = vld [vmem:[#allocation3 + $0x790] sm:$0xff]  ;;  %v450_v55 = vld [vmem:[#allocation3 + $0x9f8] sm:$0xff]  ;;  %v384_v60 = vld [vmem:[#allocation3 + $0x7e8] sm:$0xff] }
  0xaa   :  { %v808_v6 = vadd.f32 %v807_v58, %v806_v49  ;;  %v1005_v7 = vrot.slane %v1004_v59, 1  ;;  %v1389_v8 = vsel %vm1376_vm1, %v709_v57, %v1388_v2  ;;  %v1103_v14 = vadd.f32 %v1102_v0, %v1101_v53 }
  0xab   :  { %v907_v13 = vadd.f32 %v906_v63, %v905_v52  ;;  %v1202_v15 = vadd.f32 %v1201_v1, %v1200_v54  ;;  %v593_v19 = vadd.f32 %v186_v62, %v175_v61  ;;  %v495_v25 = vadd.f32 %v494_v12, %v153_v3  ;;  %v439_v54 = vld [vmem:[#allocation3 + $0x9a0] sm:$0xff]  ;;  %v428_v61 = vld [vmem:[#allocation3 + $0x948] sm:$0xff]  ;;  %v461_v1 = vld [vmem:[#allocation3 + $0xa50] sm:$0xff] }
  0xac   :  { %v1006_v20 = vadd.f32 %v1005_v7, %v1004_v59  ;;  %v1390_v21 = vsel %vm1378_vm2, %v808_v6, %v1389_v8  ;;  %v692_v26 = vadd.f32 %v230_v5, %v219_v4  ;;  %v1104_v27 = vrot.slane %v1103_v14, 1 }
  0xad   :  { %v1203_v28 = vrot.slane %v1202_v15, 1  ;;  %v1391_v29 = vsel %vm1380_vm3, %v907_v13, %v1390_v21  ;;  %v594_v33 = vadd.f32 %v593_v19, %v197_v10  ;;  %v496_v38 = vadd.f32 %v495_v25, %v164_v9  ;;  %v472_v10 = vld [vmem:[#allocation3 + $0xaa8] sm:$0xff] }
  0xae   :  { %v1392_v34 = vsel %vm1382_vm4, %v1006_v20, %v1391_v29  ;;  %v693_v39 = vadd.f32 %v692_v26, %v241_v16  ;;  %v791_v40 = vadd.f32 %v274_v18, %v263_v17  ;;  %v1105_v41 = vadd.f32 %v1104_v27, %v1103_v14 }
  0xaf   :  { %v1204_v42 = vadd.f32 %v1203_v28, %v1202_v15  ;;  %v595_v44 = vadd.f32 %v594_v33, %v208_v11  ;;  %v890_v45 = vadd.f32 %v318_v24, %v307_v23  ;;  %v497_v49 = vrot.slane %v496_v38, 4 }
  0xb0   :  { %v694_v50 = vadd.f32 %v693_v39, %v252_v22  ;;  %v792_v51 = vadd.f32 %v791_v40, %v285_v30  ;;  %v989_v52 = vadd.f32 %v362_v32, %v351_v31  ;;  %v1393_v53 = vsel %vm1384_vm5, %v1105_v41, %v1392_v34  ;;  %v1585_v31 = vld [vmem:[#allocation6 + $0x280] sm:$0xff]  ;;  %v1586_v32 = vld [vmem:[#allocation6 + $0x288] sm:$0xff]  ;;  %v134_v41 = vld [vmem:[#allocation3 + $0x18] sm:$0xff] }
  0xb1   :  { %v596_v56 = vrot.slane %v595_v44, 4  ;;  %v891_v57 = vadd.f32 %v890_v45, %v329_v35  ;;  %v1088_v58 = vadd.f32 %v406_v37, %v395_v36  ;;  %v1394_v59 = vsel %vm1386_vm6, %v1204_v42, %v1393_v53  ;;  %v145_v42 = vld [vmem:[#allocation3 + $0x70] sm:$0xff] }
  0xb2   :  { %v498_v62 = vadd.f32 %v497_v49, %v496_v38  ;;  %v695_v63 = vrot.slane %v694_v50, 4  ;;  %v793_v0 = vadd.f32 %v792_v51, %v296_v43  ;;  %1752 = vmatprep.mubr.f32.mxu0 %v1394_v59  ;;  %v990_v4 = vadd.f32 %v989_v52, %v373_v47  ;;  %v156_v47 = vld [vmem:[#allocation3 + $0xc8] sm:$0xff]  ;;  %v189_v49 = vld [vmem:[#allocation3 + $0x1d0] sm:$0xff] }
  0xb3   :  { %v597_v2 = vadd.f32 %v596_v56, %v595_v44  ;;  %v892_v3 = vadd.f32 %v891_v57, %v340_v46  ;;  %v1089_v5 = vadd.f32 %v1088_v58, %v417_v48  ;;  %v1187_v9 = vadd.f32 %v450_v55, %v439_v54  ;;  %v178_v48 = vld [vmem:[#allocation3 + $0x178] sm:$0xff]  ;;  %v167_v54 = vld [vmem:[#allocation3 + $0x120] sm:$0xff]  ;;  %v233_v56 = vld [vmem:[#allocation3 + $0x330] sm:$0xff] }
  0xb4   :  { %v499_v6 = vrot.slane %v498_v62, 2  ;;  %v696_v7 = vadd.f32 %v695_v63, %v694_v50  ;;  %v794_v8 = vrot.slane %v793_v0, 4  ;;  %v991_v13 = vadd.f32 %v990_v4, %v384_v60  ;;  %v222_v55 = vld [vmem:[#allocation3 + $0x2d8] sm:$0xff]  ;;  %v200_v60 = vld [vmem:[#allocation3 + $0x228] sm:$0xff]  ;;  %v277_v4 = vld [vmem:[#allocation3 + $0x490] sm:$0xff] }
  0xb5   :  { %v598_v11 = vrot.slane %v597_v2, 2  ;;  %v893_v12 = vrot.slane %v892_v3, 4  ;;  %v1090_v14 = vadd.f32 %v1089_v5, %v428_v61  ;;  %v1188_v18 = vadd.f32 %v1187_v9, %v461_v1  ;;  %v211_v61 = vld [vmem:[#allocation3 + $0x280] sm:$0xff]  ;;  %v310_v5 = vld [vmem:[#allocation3 + $0x598] sm:$0xff]  ;;  %v321_v9 = vld [vmem:[#allocation3 + $0x5f0] sm:$0xff] }
  0xb6   :  { %v500_v15 = vadd.f32 %v499_v6, %v498_v62  ;;  %v697_v16 = vrot.slane %v696_v7, 2  ;;  %v795_v17 = vadd.f32 %v794_v8, %v793_v0  ;;  %v992_v21 = vrot.slane %v991_v13, 4  ;;  %v244_v62 = vld [vmem:[#allocation3 + $0x388] sm:$0xff] }
  0xb7   :  { %v599_v19 = vadd.f32 %v598_v11, %v597_v2  ;;  %v894_v20 = vadd.f32 %v893_v12, %v892_v3  ;;  %v1091_v22 = vrot.slane %v1090_v14, 4  ;;  %v1189_v26 = vadd.f32 %v1188_v18, %v472_v10  ;;  %v266_v3 = vld [vmem:[#allocation3 + $0x438] sm:$0xff]  ;;  %v365_v11 = vld [vmem:[#allocation3 + $0x750] sm:$0xff] }
  0xb8   :  { %v501_v23 = vrot.slane %v500_v15, 1  ;;  %v698_v24 = vadd.f32 %v697_v16, %v696_v7  ;;  %v796_v25 = vrot.slane %v795_v17, 2  ;;  %v993_v29 = vadd.f32 %v992_v21, %v991_v13  ;;  %v354_v10 = vld [vmem:[#allocation3 + $0x6f8] sm:$0xff]  ;;  %v332_v21 = vld [vmem:[#allocation3 + $0x648] sm:$0xff] }
  0xb9   :  { %v600_v27 = vrot.slane %v599_v19, 1  ;;  %v895_v28 = vrot.slane %v894_v20, 2  ;;  %v1092_v30 = vadd.f32 %v1091_v22, %v1090_v14  ;;  %v1190_v36 = vrot.slane %v1189_v26, 4  ;;  %v376_v22 = vld [vmem:[#allocation3 + $0x7a8] sm:$0xff] }
  0xba   :  { %v502_v33 = vadd.f32 %v501_v23, %v500_v15  ;;  %v699_v34 = vrot.slane %v698_v24, 1  ;;  %v797_v35 = vadd.f32 %v796_v25, %v795_v17  ;;  %v994_v39 = vrot.slane %v993_v29, 2  ;;  %v255_v17 = vld [vmem:[#allocation3 + $0x3e0] sm:$0xff] }
  0xbb   :  { %v601_v37 = vadd.f32 %v600_v27, %v599_v19  ;;  %v896_v38 = vadd.f32 %v895_v28, %v894_v20  ;;  %v1093_v40 = vrot.slane %v1092_v30, 2  ;;  %v1191_v45 = vadd.f32 %v1190_v36, %v1189_v26  ;;  %v288_v20 = vld [vmem:[#allocation3 + $0x4e8] sm:$0xff]  ;;  %v398_v27 = vld [vmem:[#allocation3 + $0x858] sm:$0xff]  ;;  %v409_v28 = vld [vmem:[#allocation3 + $0x8b0] sm:$0xff] }
  0xbc   :  { %v700_v43 = vadd.f32 %v699_v34, %v698_v24  ;;  %v798_v44 = vrot.slane %v797_v35, 1  ;;  %v2713_v46 = vpack.c.bf16 %v1586_v32, %v1585_v31  ;;  %v995_v51 = vadd.f32 %v994_v39, %v993_v29  ;;  %v299_v34 = vld [vmem:[#allocation3 + $0x540] sm:$0xff]  ;;  %v420_v39 = vld [vmem:[#allocation3 + $0x908] sm:$0xff] }
  0xbd   :  { %v897_v50 = vrot.slane %v896_v38, 1  ;;  %v1094_v52 = vadd.f32 %v1093_v40, %v1092_v30  ;;  %v1375_v53 = vsel %vm1374_vm0, %v601_v37, %v502_v33  ;;  %v1192_v58 = vrot.slane %v1191_v45, 2  ;;  %v387_v36 = vld [vmem:[#allocation3 + $0x800] sm:$0xff]  ;;  %v442_v40 = vld [vmem:[#allocation3 + $0x9b8] sm:$0xff] }
  0xbe   :  { %v799_v57 = vadd.f32 %v798_v44, %v797_v35  ;;  %v1377_v59 = vsel %vm1376_vm1, %v700_v43, %v1375_v53  ;;  %2714 = vmatprep.subr.bf16.mxu0 %v2713_v46  ;;  %v521_v63 = vadd.f32 %v145_v42, %v134_v41  ;;  %v996_v1 = vrot.slane %v995_v51, 1  ;;  %v343_v35 = vld [vmem:[#allocation3 + $0x6a0] sm:$0xff]  ;;  %v453_v41 = vld [vmem:[#allocation3 + $0xa10] sm:$0xff] }
  0xbf   :  { %v898_v0 = vadd.f32 %v897_v50, %v896_v38  ;;  %v1095_v2 = vrot.slane %v1094_v52, 1  ;;  %v620_v6 = vadd.f32 %v189_v49, %v178_v48  ;;  %v1193_v7 = vadd.f32 %v1192_v58, %v1191_v45  ;;  %v431_v50 = vld [vmem:[#allocation3 + $0x960] sm:$0xff] }
  0xc0   :  { %v1379_v8 = vsel %vm1378_vm2, %v799_v57, %v1377_v59  ;;  %v522_v12 = vadd.f32 %v521_v63, %v156_v47  ;;  %v719_v13 = vadd.f32 %v233_v56, %v222_v55  ;;  %v997_v14 = vadd.f32 %v996_v1, %v995_v51  ;;  %v464_v51 = vld [vmem:[#allocation3 + $0xa68] sm:$0xff] }
  0xc1   :  { %v1096_v15 = vadd.f32 %v1095_v2, %v1094_v52  ;;  %v1381_v16 = vsel %vm1380_vm3, %v898_v0, %v1379_v8  ;;  %v621_v18 = vadd.f32 %v620_v6, %v200_v60  ;;  %v1194_v19 = vrot.slane %v1193_v7, 1  ;;  %v475_v60 = vld [vmem:[#allocation3 + $0xac0] sm:$0xff] }
  0xc2   :  { %v523_v23 = vadd.f32 %v522_v12, %v167_v54  ;;  %v720_v24 = vadd.f32 %v719_v13, %v244_v62  ;;  %v818_v25 = vadd.f32 %v277_v4, %v266_v3  ;;  %v1383_v26 = vsel %vm1382_vm4, %v997_v14, %v1381_v16 }
  0xc3   :  { %v622_v29 = vadd.f32 %v621_v18, %v211_v61  ;;  %v917_v30 = vadd.f32 %v321_v9, %v310_v5  ;;  %v1016_v31 = vadd.f32 %v365_v11, %v354_v10  ;;  %v1195_v32 = vadd.f32 %v1194_v19, %v1193_v7  ;;  %v1570_v18 = vld [vmem:[#allocation6 + $0x208] sm:$0xff] }
  0xc4   :  { %v1385_v33 = vsel %vm1384_vm5, %v1096_v15, %v1383_v26  ;;  %v524_v37 = vrot.slane %v523_v23, 4  ;;  %v721_v38 = vadd.f32 %v720_v24, %v255_v17  ;;  %v819_v43 = vadd.f32 %v818_v25, %v288_v20  ;;  %v1569_v17 = vld [vmem:[#allocation6 + $0x200] sm:$0xff] }
  0xc5   :  { %v623_v42 = vrot.slane %v622_v29, 4  ;;  %v918_v44 = vadd.f32 %v917_v30, %v332_v21  ;;  %v1017_v45 = vadd.f32 %v1016_v31, %v376_v22  ;;  %v1387_v46 = vsel %vm1386_vm6, %v1195_v32, %v1385_v33 }
  0xc6   :  { %v525_v47 = vadd.f32 %v524_v37, %v523_v23  ;;  %v722_v48 = vrot.slane %v721_v38, 4  ;;  %v1115_v49 = vadd.f32 %v409_v28, %v398_v27  ;;  %1753 = vmatmul.mubr.f32.vlgmr.msra.gmra.mrb[0].mxu0 %v1387_v46  ;;  %v820_v53 = vadd.f32 %v819_v43, %v299_v34  ;;  %v133_v27 = vld [vmem:[#allocation3 + $0x10] sm:$0xff]  ;;  %v144_v28 = vld [vmem:[#allocation3 + $0x68] sm:$0xff] }
  0xc7   :  { %v624_v52 = vadd.f32 %v623_v42, %v622_v29  ;;  %v919_v54 = vadd.f32 %v918_v44, %v343_v35  ;;  %v1018_v55 = vadd.f32 %v1017_v45, %v387_v36  ;;  %v1214_v59 = vadd.f32 %v453_v41, %v442_v40  ;;  %v155_v29 = vld [vmem:[#allocation3 + $0xc0] sm:$0xff]  ;;  %v177_v34 = vld [vmem:[#allocation3 + $0x170] sm:$0xff]  ;;  %v188_v35 = vld [vmem:[#allocation3 + $0x1c8] sm:$0xff] }
  0xc8   :  { %v526_v56 = vrot.slane %v525_v47, 2  ;;  %v723_v57 = vadd.f32 %v722_v48, %v721_v38  ;;  %v1116_v58 = vadd.f32 %v1115_v49, %v420_v39  ;;  %v821_v62 = vrot.slane %v820_v53, 4  ;;  %v199_v36 = vld [vmem:[#allocation3 + $0x220] sm:$0xff]  ;;  %v221_v41 = vld [vmem:[#allocation3 + $0x2d0] sm:$0xff]  ;;  %v232_v42 = vld [vmem:[#allocation3 + $0x328] sm:$0xff] }
  0xc9   :  { %v625_v61 = vrot.slane %v624_v52, 2  ;;  %v920_v63 = vrot.slane %v919_v54, 4  ;;  %v1019_v0 = vrot.slane %v1018_v55, 4  ;;  %v1215_v4 = vadd.f32 %v1214_v59, %v464_v51  ;;  %v265_v43 = vld [vmem:[#allocation3 + $0x430] sm:$0xff]  ;;  %v320_v49 = vld [vmem:[#allocation3 + $0x5e8] sm:$0xff]  ;;  %v243_v59 = vld [vmem:[#allocation3 + $0x380] sm:$0xff] }
  0xca   :  { %v527_v1 = vadd.f32 %v526_v56, %v525_v47  ;;  %v724_v2 = vrot.slane %v723_v57, 2  ;;  %v1117_v3 = vadd.f32 %v1116_v58, %v431_v50  ;;  %v822_v6 = vadd.f32 %v821_v62, %v820_v53  ;;  %v276_v47 = vld [vmem:[#allocation3 + $0x488] sm:$0xff]  ;;  %v309_v48 = vld [vmem:[#allocation3 + $0x590] sm:$0xff]  ;;  %v210_v58 = vld [vmem:[#allocation3 + $0x278] sm:$0xff] }
  0xcb   :  { %v626_v5 = vadd.f32 %v625_v61, %v624_v52  ;;  %v921_v7 = vadd.f32 %v920_v63, %v919_v54  ;;  %v1020_v8 = vadd.f32 %v1019_v0, %v1018_v55  ;;  %v1216_v12 = vadd.f32 %v1215_v4, %v475_v60  ;;  %v166_v54 = vld [vmem:[#allocation3 + $0x118] sm:$0xff]  ;;  %v287_v60 = vld [vmem:[#allocation3 + $0x4e0] sm:$0xff] }
  0xcc   :  { %v528_v9 = vrot.slane %v527_v1, 1  ;;  %v725_v10 = vadd.f32 %v724_v2, %v723_v57  ;;  %v1118_v11 = vrot.slane %v1117_v3, 4  ;;  %v823_v14 = vrot.slane %v822_v6, 2  ;;  %v254_v0 = vld [vmem:[#allocation3 + $0x3d8] sm:$0xff] }
  0xcd   :  { %v627_v13 = vrot.slane %v626_v5, 1  ;;  %v922_v15 = vrot.slane %v921_v7, 2  ;;  %v1021_v16 = vrot.slane %v1020_v8, 2  ;;  %v1217_v22 = vrot.slane %v1216_v12, 4 }
  0xce   :  { %v529_v19 = vadd.f32 %v528_v9, %v527_v1  ;;  %v726_v20 = vrot.slane %v725_v10, 1  ;;  %v1119_v21 = vadd.f32 %v1118_v11, %v1117_v3  ;;  %v824_v24 = vadd.f32 %v823_v14, %v822_v6  ;;  %v331_v1 = vld [vmem:[#allocation3 + $0x640] sm:$0xff]  ;;  %v353_v9 = vld [vmem:[#allocation3 + $0x6f0] sm:$0xff] }
  0xcf   :  { %v628_v23 = vadd.f32 %v627_v13, %v626_v5  ;;  %v923_v25 = vadd.f32 %v922_v15, %v921_v7  ;;  %v1022_v26 = vadd.f32 %v1021_v16, %v1020_v8  ;;  %v1218_v32 = vadd.f32 %v1217_v22, %v1216_v12  ;;  %v298_v8 = vld [vmem:[#allocation3 + $0x538] sm:$0xff]  ;;  %v397_v14 = vld [vmem:[#allocation3 + $0x850] sm:$0xff]  ;;  %v408_v15 = vld [vmem:[#allocation3 + $0x8a8] sm:$0xff] }
  0xd0   :  { %v727_v30 = vadd.f32 %v726_v20, %v725_v10  ;;  %v1120_v31 = vrot.slane %v1119_v21, 2  ;;  %v2715_v33 = vpack.c.bf16 %v1570_v18, %v1569_v17  ;;  %v825_v37 = vrot.slane %v824_v24, 1  ;;  %v364_v10 = vld [vmem:[#allocation3 + $0x748] sm:$0xff]  ;;  %v342_v13 = vld [vmem:[#allocation3 + $0x698] sm:$0xff] }
  0xd1   :  { %v924_v38 = vrot.slane %v923_v25, 1  ;;  %v1023_v39 = vrot.slane %v1022_v26, 1  ;;  %v1402_v40 = vsel %vm1374_vm0, %v628_v23, %v529_v19  ;;  %v1219_v45 = vrot.slane %v1218_v32, 2 }
  0xd2   :  { %v1121_v44 = vadd.f32 %v1120_v31, %v1119_v21  ;;  %v1403_v46 = vsel %vm1376_vm1, %v727_v30, %v1402_v40  ;;  %2716 = vmatpush3.bf16.msra.mxu0 %v2715_v33  ;;  %v512_v50 = vadd.f32 %v144_v28, %v133_v27  ;;  %v826_v51 = vadd.f32 %v825_v37, %v824_v24  ;;  %v375_v21 = vld [vmem:[#allocation3 + $0x7a0] sm:$0xff] }
  0xd3   :  { %v925_v52 = vadd.f32 %v924_v38, %v923_v25  ;;  %v1024_v53 = vadd.f32 %v1023_v39, %v1022_v26  ;;  %v611_v55 = vadd.f32 %v188_v35, %v177_v34  ;;  %v1220_v57 = vadd.f32 %v1219_v45, %v1218_v32  ;;  %v419_v24 = vld [vmem:[#allocation3 + $0x900] sm:$0xff]  ;;  %v441_v25 = vld [vmem:[#allocation3 + $0x9b0] sm:$0xff]  ;;  %v452_v26 = vld [vmem:[#allocation3 + $0xa08] sm:$0xff] }
  0xd4   :  { %v1122_v56 = vrot.slane %v1121_v44, 1  ;;  %v513_v61 = vadd.f32 %v512_v50, %v155_v29  ;;  %v710_v62 = vadd.f32 %v232_v42, %v221_v41  ;;  %v1404_v63 = vsel %vm1378_vm2, %v826_v51, %v1403_v46  ;;  %v386_v32 = vld [vmem:[#allocation3 + $0x7f8] sm:$0xff]  ;;  %v463_v37 = vld [vmem:[#allocation3 + $0xa60] sm:$0xff] }
  0xd5   :  { %v612_v2 = vadd.f32 %v611_v55, %v199_v36  ;;  %v809_v3 = vadd.f32 %v276_v47, %v265_v43  ;;  %v908_v4 = vadd.f32 %v320_v49, %v309_v48  ;;  %v1221_v6 = vrot.slane %v1220_v57, 1  ;;  %v430_v36 = vld [vmem:[#allocation3 + $0x958] sm:$0xff] }
  0xd6   :  { %v1123_v5 = vadd.f32 %v1122_v56, %v1121_v44  ;;  %v1405_v7 = vsel %vm1380_vm3, %v925_v52, %v1404_v63  ;;  %v514_v11 = vadd.f32 %v513_v61, %v166_v54  ;;  %v711_v17 = vadd.f32 %v710_v62, %v243_v59  ;;  %v474_v46 = vld [vmem:[#allocation3 + $0xab8] sm:$0xff]  ;;  %v1617_v63 = vld [vmem:[#allocation6 + $0x380] sm:$0xff] }
  0xd7   :  { %v1406_v12 = vsel %vm1382_vm4, %v1024_v53, %v1405_v7  ;;  %v613_v16 = vadd.f32 %v612_v2, %v210_v58  ;;  %v810_v18 = vadd.f32 %v809_v3, %v287_v60  ;;  %v1222_v19 = vadd.f32 %v1221_v6, %v1220_v57  ;;  %v3259_v6 = vld [vmem:[#allocation6 + $0x308] sm:$0xff] }
  0xd8   :  { %v1407_v20 = vsel %vm1384_vm5, %v1123_v5, %v1406_v12  ;;  %v515_v22 = vrot.slane %v514_v11, 4  ;;  %v909_v23 = vadd.f32 %v908_v4, %v331_v1  ;;  %v712_v28 = vadd.f32 %v711_v17, %v254_v0  ;;  %v1618_v4 = vld [vmem:[#allocation6 + $0x388] sm:$0xff]  ;;  %v3257_v5 = vld [vmem:[#allocation6 + $0x300] sm:$0xff]  ;;  %v1588_v12 = vld [vmem:[#allocation6 + $0x298] sm:$0xff] }
  0xd9   :  { %v614_v27 = vrot.slane %v613_v16, 4  ;;  %v811_v29 = vadd.f32 %v810_v18, %v298_v8  ;;  %v1007_v30 = vadd.f32 %v364_v10, %v353_v9  ;;  %v1408_v31 = vsel %vm1386_vm6, %v1222_v19, %v1407_v20  ;;  %v3263_v18 = vld [vmem:[#allocation6 + $0x218] sm:$0xff]  ;;  %v3265_v19 = vld [vmem:[#allocation6 + $0x390] sm:$0xff] }
  0xda   :  { %v516_v33 = vadd.f32 %v515_v22, %v514_v11  ;;  %v910_v34 = vadd.f32 %v909_v23, %v342_v13  ;;  %v1106_v35 = vadd.f32 %v408_v15, %v397_v14  ;;  %1822 = vmatprep.mubr.f32.mxu1 %v1408_v31  ;;  %v713_v39 = vrot.slane %v712_v28, 4  ;;  %v1587_v11 = vld [vmem:[#allocation6 + $0x290] sm:$0xff]  ;;  %v3267_v20 = vld [vmem:[#allocation6 + $0x398] sm:$0xff] }
  0xdb   :  { %v615_v38 = vadd.f32 %v614_v27, %v613_v16  ;;  %v812_v40 = vrot.slane %v811_v29, 4  ;;  %v1008_v41 = vadd.f32 %v1007_v30, %v375_v21  ;;  %v1205_v45 = vadd.f32 %v452_v26, %v441_v25  ;;  %v3261_v13 = vld [vmem:[#allocation6 + $0x210] sm:$0xff]  ;;  %v3271_v26 = vld [vmem:[#allocation6 + $0x318] sm:$0xff]  ;;  %v3273_v27 = vld [vmem:[#allocation6 + $0x2a0] sm:$0xff] }
  0xdc   :  { %v517_v42 = vrot.slane %v516_v33, 2  ;;  %v911_v43 = vrot.slane %v910_v34, 4  ;;  %v1107_v44 = vadd.f32 %v1106_v35, %v419_v24  ;;  %v714_v48 = vadd.f32 %v713_v39, %v712_v28  ;;  %v3269_v25 = vld [vmem:[#allocation6 + $0x310] sm:$0xff]  ;;  %v3275_v28 = vld [vmem:[#allocation6 + $0x2a8] sm:$0xff]  ;;  %v3282_v35 = vld [vmem:[#allocation6 + $0x3a0] sm:$0xff] }
  0xdd   :  { %v616_v47 = vrot.slane %v615_v38, 2  ;;  %v813_v49 = vadd.f32 %v812_v40, %v811_v29  ;;  %v1009_v50 = vadd.f32 %v1008_v41, %v386_v32  ;;  %v1206_v54 = vadd.f32 %v1205_v45, %v463_v37  ;;  %v3288_v41 = vld [vmem:[#allocation6 + $0x320] sm:$0xff]  ;;  %v3296_v45 = vld [vmem:[#allocation6 + $0x230] sm:$0xff]  ;;  %v400_v40 = vld [vmem:[#allocation3 + $0x868] sm:$0xff] }
  0xde   :  { %v518_v51 = vadd.f32 %v517_v42, %v516_v33  ;;  %v912_v52 = vadd.f32 %v911_v43, %v910_v34  ;;  %v1108_v53 = vadd.f32 %v1107_v44, %v430_v36  ;;  %v715_v56 = vrot.slane %v714_v48, 2  ;;  %v3278_v33 = vld [vmem:[#allocation6 + $0x220] sm:$0xff]  ;;  %v3280_v34 = vld [vmem:[#allocation6 + $0x228] sm:$0xff]  ;;  %v3292_v43 = vld [vmem:[#allocation6 + $0x2b0] sm:$0xff] }
  0xdf   :  { %v617_v55 = vadd.f32 %v616_v47, %v615_v38  ;;  %v814_v57 = vrot.slane %v813_v49, 2  ;;  %v1010_v58 = vrot.slane %v1009_v50, 4  ;;  %v1207_v62 = vadd.f32 %v1206_v54, %v474_v46  ;;  %v3284_v36 = vld [vmem:[#allocation6 + $0x3a8] sm:$0xff]  ;;  %v3294_v44 = vld [vmem:[#allocation6 + $0x2b8] sm:$0xff] }
  0xe0   :  { %v519_v59 = vrot.slane %v518_v51, 1  ;;  %v913_v60 = vrot.slane %v912_v52, 2  ;;  %v1109_v61 = vrot.slane %v1108_v53, 4  ;;  %v716_v1 = vadd.f32 %v715_v56, %v714_v48  ;;  %v3290_v42 = vld [vmem:[#allocation6 + $0x328] sm:$0xff]  ;;  %v3298_v46 = vld [vmem:[#allocation6 + $0x238] sm:$0xff] }
  0xe1   :  { %v618_v0 = vrot.slane %v617_v55, 1  ;;  %v815_v2 = vadd.f32 %v814_v57, %v813_v49  ;;  %v1011_v3 = vadd.f32 %v1010_v58, %v1009_v50  ;;  %v1208_v10 = vrot.slane %v1207_v62, 4  ;;  %v3309_v54 = vld [vmem:[#allocation6 + $0x338] sm:$0xff] }
  0xe2   :  { %v520_v7 = vadd.f32 %v519_v59, %v518_v51  ;;  %v914_v8 = vadd.f32 %v913_v60, %v912_v52  ;;  %v1110_v9 = vadd.f32 %v1109_v61, %v1108_v53  ;;  %v717_v15 = vrot.slane %v716_v1, 1  ;;  %v3303_v51 = vld [vmem:[#allocation6 + $0x3b0] sm:$0xff]  ;;  %v3305_v52 = vld [vmem:[#allocation6 + $0x3b8] sm:$0xff]  ;;  %v3314_v59 = vld [vmem:[#allocation6 + $0x2c0] sm:$0xff] }
  0xe3   :  { %v619_v14 = vadd.f32 %v618_v0, %v617_v55  ;;  %v816_v16 = vrot.slane %v815_v2, 1  ;;  %v1012_v17 = vrot.slane %v1011_v3, 2  ;;  %v1209_v23 = vadd.f32 %v1208_v10, %v1207_v62  ;;  %v3307_v53 = vld [vmem:[#allocation6 + $0x330] sm:$0xff]  ;;  %v3316_v60 = vld [vmem:[#allocation6 + $0x2c8] sm:$0xff]  ;;  %v3318_v61 = vld [vmem:[#allocation6 + $0x240] sm:$0xff] }
  0xe4   :  { %v915_v21 = vrot.slane %v914_v8, 1  ;;  %v1111_v22 = vrot.slane %v1110_v9, 2  ;;  %v2745_v24 = vpack.c.bf16 %v1618_v4, %v1617_v63  ;;  %v718_v29 = vadd.f32 %v717_v15, %v716_v1  ;;  %v3320_v62 = vld [vmem:[#allocation6 + $0x248] sm:$0xff]  ;;  %v3322_v63 = vld [vmem:[#allocation6 + $0x3c0] sm:$0xff]  ;;  %v3337_v10 = vld [vmem:[#allocation6 + $0x2d8] sm:$0xff] }
  0xe5   :  { %v817_v30 = vadd.f32 %v816_v16, %v815_v2  ;;  %v1013_v31 = vadd.f32 %v1012_v17, %v1011_v3  ;;  %v1395_v32 = vsel %vm1374_vm0, %v619_v14, %v520_v7  ;;  %v1210_v39 = vrot.slane %v1209_v23, 2  ;;  %3770 = vst [vmem:[#allocation21_spill] sm:$0xff] %v3322_v63  ;;  %v3324_v0 = vld [vmem:[#allocation6 + $0x3c8] sm:$0xff]  ;;  %v3326_v1 = vld [vmem:[#allocation6 + $0x340] sm:$0xff]  ;;  %v3345_v14 = vld [vmem:[#allocation6 + $0x3d8] sm:$0xff] }
  0xe6   :  { %v916_v37 = vadd.f32 %v915_v21, %v914_v8  ;;  %v1112_v38 = vadd.f32 %v1111_v22, %v1110_v9  ;;  %2746 = vmatprep.subr.bf16.mxu1 %v2745_v24  ;;  %v1396_v48 = vsel %vm1376_vm1, %v718_v29, %v1395_v32  ;;  %v2717_v49 = vpack.c.bf16 %v1588_v12, %v1587_v11  ;;  %v3328_v2 = vld [vmem:[#allocation6 + $0x348] sm:$0xff]  ;;  %v3335_v9 = vld [vmem:[#allocation6 + $0x2d0] sm:$0xff]  ;;  %v3341_v12 = vld [vmem:[#allocation6 + $0x258] sm:$0xff] }
  0xe7   :  { %v1014_v47 = vrot.slane %v1013_v31, 1  ;;  %v2719_v50 = vpack.c.bf16 %v3263_v18, %v3261_v13  ;;  %v1211_v56 = vadd.f32 %v1210_v39, %v1209_v23  ;;  %v1397_v57 = vsel %vm1378_vm2, %v817_v30, %v1396_v48  ;;  %3771 = vst [vmem:[#allocation22_spill] sm:$0xff] %v3324_v0  ;;  %3772 = vst [vmem:[#allocation23_spill] sm:$0xff] %v3326_v1  ;;  %v3339_v11 = vld [vmem:[#allocation6 + $0x250] sm:$0xff]  ;;  %v3353_v22 = vld [vmem:[#allocation6 + $0x358] sm:$0xff] }
  0xe8   :  { %v1113_v55 = vrot.slane %v1112_v38, 1  ;;  %3773 = vst [vmem:[#allocation24_spill] sm:$0xff] %v3328_v2  ;;  %v1398_v4 = vsel %vm1380_vm3, %v916_v37, %v1397_v57  ;;  %2718 = vmatprep.subr.bf16.mxu0 %v2717_v49  ;;  %v2721_v8 = vpack.c.bf16 %v3275_v28, %v3273_v27  ;;  %v3343_v13 = vld [vmem:[#allocation6 + $0x3d0] sm:$0xff]  ;;  %3775 = vst [vmem:[#allocation26_spill] sm:$0xff] %v3345_v14  ;;  %v3355_v23 = vld [vmem:[#allocation6 + $0x2e0] sm:$0xff] }
  0xe9   :  { %v1015_v3 = vadd.f32 %v1014_v47, %v1013_v31  ;;  %3774 = vst [vmem:[#allocation25_spill] sm:$0xff] %v3343_v13  ;;  %v1212_v16 = vrot.slane %v1211_v56, 1  ;;  %2720 = vmatpush3.bf16.msra.mxu0 %v2719_v50  ;;  %v2723_v17 = vpack.c.bf16 %v3280_v34, %v3278_v33  ;;  %v3351_v21 = vld [vmem:[#allocation6 + $0x350] sm:$0xff]  ;;  %3777 = vst [vmem:[#allocation28_spill] sm:$0xff] %v3353_v22  ;;  %v3357_v24 = vld [vmem:[#allocation6 + $0x2e8] sm:$0xff] }
  0xea   :  { %v1114_v15 = vadd.f32 %v1113_v55, %v1112_v38  ;;  %3776 = vst [vmem:[#allocation27_spill] sm:$0xff] %v3351_v21  ;;  %v3359_v27 = vld [vmem:[#allocation6 + $0x260] sm:$0xff]  ;;  %v3361_v28 = vld [vmem:[#allocation6 + $0x268] sm:$0xff]  ;;  %2722 = vmatprep.subr.bf16.mxu0 %v2721_v8  ;;  %v2725_v31 = vpack.c.bf16 %v3294_v44, %v3292_v43  ;;  %v3378_v39 = vld [vmem:[#allocation6 + $0x2f0] sm:$0xff]  ;;  %v3788_v13 = vpack.c.bf16 %v3259_v6, %v3257_v5 }
  0xeb   :  { %v1399_v29 = vsel %vm1382_vm4, %v1015_v3, %v1398_v4  ;;  %v3370_v33 = vld [vmem:[#allocation6 + $0x3e0] sm:$0xff]  ;;  %v3372_v34 = vld [vmem:[#allocation6 + $0x3e8] sm:$0xff]  ;;  %3782 = vst [vmem:[#allocation33_spill] sm:$0xff] %v3378_v39  ;;  %v3380_v47 = vld [vmem:[#allocation6 + $0x2f8] sm:$0xff]  ;;  %v1213_v43 = vadd.f32 %v1212_v16, %v1211_v56  ;;  %v2729_v56 = vpack.c.bf16 %v3316_v60, %v3314_v59  ;;  %v3789_v5 = vpack.c.bf16 %v3267_v20, %v3265_v19 }
  0xec   :  { %3778 = vst [vmem:[#allocation29_spill] sm:$0xff] %v3370_v33  ;;  %3779 = vst [vmem:[#allocation30_spill] sm:$0xff] %v3372_v34  ;;  %v3374_v37 = vld [vmem:[#allocation6 + $0x360] sm:$0xff]  ;;  %v3376_v38 = vld [vmem:[#allocation6 + $0x368] sm:$0xff]  ;;  %v1400_v44 = vsel %vm1384_vm5, %v1114_v15, %v1399_v29 }
  0xed   :  { %3780 = vst [vmem:[#allocation31_spill] sm:$0xff] %v3374_v37  ;;  %3781 = vst [vmem:[#allocation32_spill] sm:$0xff] %v3376_v38  ;;  %v3382_v48 = vld [vmem:[#allocation6 + $0x270] sm:$0xff]  ;;  %v3384_v49 = vld [vmem:[#allocation6 + $0x278] sm:$0xff]  ;;  %v1401_v58 = vsel %vm1386_vm6, %v1213_v43, %v1400_v44  ;;  %2724 = vmatpush3.bf16.msra.mxu0 %v2723_v17  ;;  %v3790_v43 = vpack.c.bf16 %v3298_v46, %v3296_v45 }
  0xee   :  { %3783 = vst [vmem:[#allocation34_spill] sm:$0xff] %v3380_v47  ;;  %3784 = vst [vmem:[#allocation35_spill] sm:$0xff] %v3382_v48  ;;  %v3391_v57 = vld [vmem:[#allocation6 + $0x3f0] sm:$0xff]  ;;  %v3393_v3 = vld [vmem:[#allocation6 + $0x3f8] sm:$0xff]  ;;  %1823 = vmatmul.mubr.f32.vlgmr.msra.gmra.mrb[0].mxu1 %v1401_v58  ;;  %2726 = vmatprep.subr.bf16.mxu0 %v2725_v31 }
  0xef   :  { %3785 = vst [vmem:[#allocation36_spill] sm:$0xff] %v3384_v49  ;;  %3786 = vst [vmem:[#allocation37_spill] sm:$0xff] %v3391_v57  ;;  %v136_v4 = vld [vmem:[#allocation3 + $0x28] sm:$0xff]  ;;  %v147_v8 = vld [vmem:[#allocation3 + $0x80] sm:$0xff]  ;;  %2748 = vmatpush3.bf16.msra.mxu1 %v3788_v13 }
  0xf0   :  { %3787 = vst [vmem:[#allocation38_spill] sm:$0xff] %v3393_v3  ;;  %v180_v30 = vld [vmem:[#allocation3 + $0x188] sm:$0xff]  ;;  %v191_v18 = vld [vmem:[#allocation3 + $0x1e0] sm:$0xff]  ;;  %v158_v15 = vld [vmem:[#allocation3 + $0xd8] sm:$0xff]  ;;  %2750 = vmatprep.subr.bf16.mxu1 %v3789_v5  ;;  %v539_v37 = vadd.f32 %v147_v8, %v136_v4 }
  0xf1   :  { %v224_v7 = vld [vmem:[#allocation3 + $0x2e8] sm:$0xff]  ;;  %v235_v55 = vld [vmem:[#allocation3 + $0x340] sm:$0xff]  ;;  %v202_v16 = vld [vmem:[#allocation3 + $0x238] sm:$0xff]  ;;  %v638_v17 = vadd.f32 %v191_v18, %v180_v30  ;;  %2728 = vmatpush3.bf16.msra.mxu0 %v3790_v43 }
  0xf2   :  { %v268_v50 = vld [vmem:[#allocation3 + $0x448] sm:$0xff]  ;;  %v279_v32 = vld [vmem:[#allocation3 + $0x4a0] sm:$0xff]  ;;  %v246_v63 = vld [vmem:[#allocation3 + $0x398] sm:$0xff]  ;;  %v737_v38 = vadd.f32 %v235_v55, %v224_v7  ;;  %2730 = vmatprep.subr.bf16.mxu0 %v2729_v56  ;;  %v540_v3 = vadd.f32 %v539_v37, %v158_v15  ;;  %v3791_v7 = vpack.c.bf16 %v3271_v26, %v3269_v25  ;;  %v3798_v56 = vpack.c.bf16 %v3357_v24, %v3355_v23 }
  0xf3   :  { %v312_v0 = vld [vmem:[#allocation3 + $0x5a8] sm:$0xff]  ;;  %v323_v29 = vld [vmem:[#allocation3 + $0x600] sm:$0xff]  ;;  %v169_v44 = vld [vmem:[#allocation3 + $0x130] sm:$0xff]  ;;  %v836_v49 = vadd.f32 %v279_v32, %v268_v50  ;;  %v639_v47 = vadd.f32 %v638_v17, %v202_v16 }
  0xf4   :  { %v356_v1 = vld [vmem:[#allocation3 + $0x708] sm:$0xff]  ;;  %v367_v59 = vld [vmem:[#allocation3 + $0x760] sm:$0xff]  ;;  %v213_v21 = vld [vmem:[#allocation3 + $0x290] sm:$0xff]  ;;  %v935_v39 = vadd.f32 %v323_v29, %v312_v0  ;;  %v738_v4 = vadd.f32 %v737_v38, %v246_v63  ;;  %2752 = vmatpush3.bf16.msra.mxu1 %v3791_v7  ;;  %v541_v0 = vadd.f32 %v540_v3, %v169_v44  ;;  %v3793_v63 = vpack.c.bf16 %v3320_v62, %v3318_v61 }
  0xf5   :  { %v411_v60 = vld [vmem:[#allocation3 + $0x8c0] sm:$0xff]  ;;  %v290_v22 = vld [vmem:[#allocation3 + $0x4f8] sm:$0xff]  ;;  %v444_v14 = vld [vmem:[#allocation3 + $0x9c8] sm:$0xff]  ;;  %v1034_v19 = vadd.f32 %v367_v59, %v356_v1  ;;  %v640_v1 = vadd.f32 %v639_v47, %v213_v21  ;;  %v3795_v21 = vpack.c.bf16 %v3290_v42, %v3288_v41  ;;  %v3799_v29 = vpack.c.bf16 %v3309_v54, %v3307_v53 }
  0xf6   :  { %v455_v2 = vld [vmem:[#allocation3 + $0xa20] sm:$0xff]  ;;  %v334_v13 = vld [vmem:[#allocation3 + $0x658] sm:$0xff]  ;;  %v257_v33 = vld [vmem:[#allocation3 + $0x3f0] sm:$0xff]  ;;  %v1133_v20 = vadd.f32 %v411_v60, %v400_v40  ;;  %v837_v46 = vadd.f32 %v836_v49, %v290_v22  ;;  %v3792_v40 = vpack.c.bf16 %v3284_v36, %v3282_v35  ;;  %2732 = vmatpush3.bf16.msra.mxu0 %v3793_v63  ;;  %v3794_v22 = vpack.c.bf16 %v3337_v10, %v3335_v9 }
  0xf7   :  { %v378_v31 = vld [vmem:[#allocation3 + $0x7b8] sm:$0xff]  ;;  %v301_v34 = vld [vmem:[#allocation3 + $0x550] sm:$0xff]  ;;  %v1232_v18 = vadd.f32 %v455_v2, %v444_v14  ;;  %v936_v30 = vadd.f32 %v935_v39, %v334_v13  ;;  %v739_v50 = vadd.f32 %v738_v4, %v257_v33  ;;  %v542_v38 = vrot.slane %v541_v0, 4  ;;  %v135_v4 = vld [vmem:[#allocation3 + $0x20] sm:$0xff] }
  0xf8   :  { %v422_v58 = vld [vmem:[#allocation3 + $0x918] sm:$0xff]  ;;  %v345_v5 = vld [vmem:[#allocation3 + $0x6b0] sm:$0xff]  ;;  %v1035_v55 = vadd.f32 %v1034_v19, %v378_v31  ;;  %2754 = vmatprep.subr.bf16.mxu1 %v3792_v40  ;;  %v838_v2 = vadd.f32 %v837_v46, %v301_v34  ;;  %2734 = vmatprep.subr.bf16.mxu0 %v3794_v22  ;;  %v641_v39 = vrot.slane %v640_v1, 4  ;;  %v3796_v34 = vpack.c.bf16 %v3305_v52, %v3303_v51 }
  0xf9   :  { %v466_v48 = vld [vmem:[#allocation3 + $0xa78] sm:$0xff]  ;;  %v389_v6 = vld [vmem:[#allocation3 + $0x810] sm:$0xff]  ;;  %v1134_v32 = vadd.f32 %v1133_v20, %v422_v58  ;;  %v937_v25 = vadd.f32 %v936_v30, %v345_v5  ;;  %v740_v35 = vrot.slane %v739_v50, 4  ;;  %2756 = vmatpush3.bf16.msra.mxu1 %v3795_v21 }
  0xfa   :  { %v433_v57 = vld [vmem:[#allocation3 + $0x970] sm:$0xff]  ;;  %v1233_v37 = vadd.f32 %v1232_v18, %v466_v48  ;;  %v1036_v26 = vadd.f32 %v1035_v55, %v389_v6  ;;  %v839_v33 = vrot.slane %v838_v2, 4  ;;  %2758 = vmatprep.subr.bf16.mxu1 %v3796_v34  ;;  %v543_v48 = vadd.f32 %v542_v38, %v541_v0  ;;  %v3470_v5 = vld [vmem:[#allocation6 + $0x378] sm:$0xff]  ;;  %v3807_v0 = vld [vmem:[#allocation24_spill] sm:$0xff] }
  0xfb   :  { %v477_v45 = vld [vmem:[#allocation3 + $0xad0] sm:$0xff]  ;;  %v1135_v14 = vadd.f32 %v1134_v32, %v433_v57  ;;  %v938_v47 = vrot.slane %v937_v25, 4  ;;  %v642_v49 = vadd.f32 %v641_v39, %v640_v1  ;;  %v741_v9 = vadd.f32 %v740_v35, %v739_v50  ;;  %v146_v40 = vld [vmem:[#allocation3 + $0x78] sm:$0xff]  ;;  %v311_v34 = vld [vmem:[#allocation3 + $0x5a0] sm:$0xff] }
  0xfc   :  { %v1234_v36 = vadd.f32 %v1233_v37, %v477_v45  ;;  %v1037_v61 = vrot.slane %v1036_v26, 4  ;;  %v3797_v57 = vpack.c.bf16 %v3341_v12, %v3339_v11  ;;  %v840_v3 = vadd.f32 %v839_v33, %v838_v2  ;;  %v3800_v17 = vld [vmem:[#allocation22_spill] sm:$0xff]  ;;  %v3801_v43 = vld [vmem:[#allocation21_spill] sm:$0xff]  ;;  %v3808_v1 = vld [vmem:[#allocation23_spill] sm:$0xff] }
  0xfd   :  { %v1136_v62 = vrot.slane %v1135_v14, 4  ;;  %v939_v8 = vadd.f32 %v938_v47, %v937_v25  ;;  %v544_v15 = vrot.slane %v543_v48, 2  ;;  %v643_v16 = vrot.slane %v642_v49, 2  ;;  %2760 = vmatpush3.bf16.msra.mxu1 %v3799_v29  ;;  %v3468_v20 = vld [vmem:[#allocation6 + $0x370] sm:$0xff]  ;;  %v234_v22 = vld [vmem:[#allocation3 + $0x338] sm:$0xff] }
  0xfe   :  { %v1235_v10 = vrot.slane %v1234_v36, 4  ;;  %2736 = vmatpush3.bf16.msra.mxu0 %v3797_v57  ;;  %v1038_v41 = vadd.f32 %v1037_v61, %v1036_v26  ;;  %v742_v51 = vrot.slane %v741_v9, 2  ;;  %v841_v59 = vrot.slane %v840_v3, 2  ;;  %v3804_v18 = vld [vmem:[#allocation34_spill] sm:$0xff]  ;;  %v3805_v7 = vld [vmem:[#allocation33_spill] sm:$0xff]  ;;  %v267_v61 = vld [vmem:[#allocation3 + $0x440] sm:$0xff] }
  0xff   :  { %v1137_v42 = vadd.f32 %v1136_v62, %v1135_v14  ;;  %2738 = vmatprep.subr.bf16.mxu0 %v3798_v56  ;;  %v940_v60 = vrot.slane %v939_v8, 2  ;;  %v3802_v44 = vpack.c.bf16 %v3800_v17, %v3801_v43  ;;  %v545_v58 = vadd.f32 %v544_v15, %v543_v48  ;;  %v157_v26 = vld [vmem:[#allocation3 + $0xd0] sm:$0xff]  ;;  %v223_v14 = vld [vmem:[#allocation3 + $0x2e0] sm:$0xff]  ;;  %v278_v62 = vld [vmem:[#allocation3 + $0x498] sm:$0xff] }
 0x100   :  { %v1236_v52 = vadd.f32 %v1235_v10, %v1234_v36  ;;  %v1039_v11 = vrot.slane %v1038_v41, 2  ;;  %v644_v31 = vadd.f32 %v643_v16, %v642_v49  ;;  %v743_v23 = vadd.f32 %v742_v51, %v741_v9  ;;  %v3810_v38 = vld [vmem:[#allocation26_spill] sm:$0xff]  ;;  %v3811_v39 = vld [vmem:[#allocation25_spill] sm:$0xff]  ;;  %v3813_v48 = vld [vmem:[#allocation36_spill] sm:$0xff] }
 0x101   :  { %v1138_v12 = vrot.slane %v1137_v42, 2  ;;  %2762 = vmatprep.subr.bf16.mxu1 %v3802_v44  ;;  %v3803_v6 = vpack.c.bf16 %v3361_v28, %v3359_v27  ;;  %v842_v13 = vadd.f32 %v841_v59, %v840_v3  ;;  %v941_v19 = vadd.f32 %v940_v60, %v939_v8  ;;  %v179_v27 = vld [vmem:[#allocation3 + $0x180] sm:$0xff]  ;;  %v190_v28 = vld [vmem:[#allocation3 + $0x1d8] sm:$0xff]  ;;  %v245_v29 = vld [vmem:[#allocation3 + $0x390] sm:$0xff] }
 0x102   :  { %v1237_v24 = vrot.slane %v1236_v52, 2  ;;  %v1040_v53 = vadd.f32 %v1039_v11, %v1038_v41  ;;  %v3806_v45 = vpack.c.bf16 %v3804_v18, %v3805_v7  ;;  %v546_v46 = vrot.slane %v545_v58, 1  ;;  %v3814_v49 = vld [vmem:[#allocation35_spill] sm:$0xff]  ;;  %v289_v59 = vld [vmem:[#allocation3 + $0x4f0] sm:$0xff]  ;;  %v3816_v11 = vld [vmem:[#allocation28_spill] sm:$0xff] }
 0x103   :  { %2740 = vmatpush3.bf16.msra.mxu0 %v3803_v6  ;;  %v1139_v54 = vadd.f32 %v1138_v12, %v1137_v42  ;;  %v645_v30 = vrot.slane %v644_v31, 1  ;;  %v744_v55 = vrot.slane %v743_v23, 1  ;;  %v3809_v50 = vpack.c.bf16 %v3807_v0, %v3808_v1  ;;  %v322_v41 = vld [vmem:[#allocation3 + $0x5f8] sm:$0xff]  ;;  %v355_v42 = vld [vmem:[#allocation3 + $0x700] sm:$0xff]  ;;  %v168_v44 = vld [vmem:[#allocation3 + $0x128] sm:$0xff] }
 0x104   :  { %2742 = vmatprep.subr.bf16.mxu0 %v3806_v45  ;;  %v1238_v32 = vadd.f32 %v1237_v24, %v1236_v52  ;;  %v843_v37 = vrot.slane %v842_v13, 1  ;;  %v942_v63 = vrot.slane %v941_v19, 1  ;;  %v1041_v2 = vrot.slane %v1040_v53, 1  ;;  %v366_v56 = vld [vmem:[#allocation3 + $0x758] sm:$0xff]  ;;  %v201_v52 = vld [vmem:[#allocation3 + $0x230] sm:$0xff]  ;;  %v399_v0 = vld [vmem:[#allocation3 + $0x860] sm:$0xff] }
 0x105   :  { %2764 = vmatpush3.bf16.msra.mxu1 %v3809_v50  ;;  %v1140_v25 = vrot.slane %v1139_v54, 1  ;;  %v3812_v35 = vpack.c.bf16 %v3810_v38, %v3811_v39  ;;  %v547_v36 = vadd.f32 %v546_v46, %v545_v58  ;;  %v646_v21 = vadd.f32 %v645_v30, %v644_v31  ;;  %v3817_v12 = vld [vmem:[#allocation27_spill] sm:$0xff]  ;;  %v333_v58 = vld [vmem:[#allocation3 + $0x650] sm:$0xff]  ;;  %v344_v30 = vld [vmem:[#allocation3 + $0x6a8] sm:$0xff] }
 0x106   :  { %v745_v33 = vadd.f32 %v744_v55, %v743_v23  ;;  %v1239_v47 = vrot.slane %v1238_v32, 1  ;;  %v3815_v9 = vpack.c.bf16 %v3813_v48, %v3814_v49  ;;  %v844_v10 = vadd.f32 %v843_v37, %v842_v13  ;;  %v377_v31 = vld [vmem:[#allocation3 + $0x7b0] sm:$0xff]  ;;  %v388_v55 = vld [vmem:[#allocation3 + $0x808] sm:$0xff]  ;;  %v410_v1 = vld [vmem:[#allocation3 + $0x8b8] sm:$0xff] }
 0x107   :  { %2766 = vmatprep.subr.bf16.mxu1 %v3812_v35  ;;  %v943_v57 = vadd.f32 %v942_v63, %v941_v19  ;;  %v1042_v3 = vadd.f32 %v1041_v2, %v1040_v53  ;;  %v1141_v8 = vadd.f32 %v1140_v25, %v1139_v54  ;;  %v1416_v16 = vsel %vm1374_vm0, %v646_v21, %v547_v36  ;;  %v3819_v13 = vld [vmem:[#allocation30_spill] sm:$0xff]  ;;  %v3820_v19 = vld [vmem:[#allocation29_spill] sm:$0xff]  ;;  %v3822_v2 = vld [vmem:[#allocation32_spill] sm:$0xff] }
 0x108   :  { %2744 = vmatpush3.bf16.msra.mxu0 %v3815_v9  ;;  %v1240_v15 = vadd.f32 %v1239_v47, %v1238_v32  ;;  %v2775_v51 = vpack.c.bf16 %v3470_v5, %v3468_v20  ;;  %v530_v60 = vadd.f32 %v146_v40, %v135_v4  ;;  %v3818_v17 = vpack.c.bf16 %v3816_v11, %v3817_v12  ;;  %v212_v20 = vld [vmem:[#allocation3 + $0x288] sm:$0xff]  ;;  %v3823_v25 = vld [vmem:[#allocation31_spill] sm:$0xff]  ;;  %v3825_v21 = vld [vmem:[#allocation38_spill] sm:$0xff] }
 0x109   :  { %v1417_v43 = vsel %vm1376_vm1, %v745_v33, %v1416_v16  ;;  %v629_v23 = vadd.f32 %v190_v28, %v179_v27  ;;  %v728_v24 = vadd.f32 %v234_v22, %v223_v14  ;;  %v827_v6 = vadd.f32 %v278_v62, %v267_v61  ;;  %v256_v5 = vld [vmem:[#allocation3 + $0x3e8] sm:$0xff]  ;;  %v443_v22 = vld [vmem:[#allocation3 + $0x9c0] sm:$0xff]  ;;  %v454_v38 = vld [vmem:[#allocation3 + $0xa18] sm:$0xff] }
 0x10a   :  { %2768 = vmatpush3.bf16.msra.mxu1 %v3818_v17  ;;  %v3821_v53 = vpack.c.bf16 %v3819_v13, %v3820_v19  ;;  %v1418_v54 = vsel %vm1378_vm2, %v844_v10, %v1417_v43  ;;  %v300_v4 = vld [vmem:[#allocation3 + $0x548] sm:$0xff]  ;;  %v531_v18 = vadd.f32 %v530_v60, %v157_v26  ;;  %v926_v7 = vadd.f32 %v322_v41, %v311_v34  ;;  %v421_v62 = vld [vmem:[#allocation3 + $0x910] sm:$0xff] }
 0x10b   :  { %v1025_v45 = vadd.f32 %v366_v56, %v355_v42  ;;  %v1419_v46 = vsel %vm1380_vm3, %v943_v57, %v1418_v54  ;;  %v630_v32 = vadd.f32 %v629_v23, %v201_v52  ;;  %v729_v40 = vadd.f32 %v728_v24, %v245_v29  ;;  %v3826_v33 = vld [vmem:[#allocation37_spill] sm:$0xff] }
 0x10c   :  { %2770 = vmatprep.subr.bf16.mxu1 %v3821_v53  ;;  %v828_v27 = vadd.f32 %v827_v6, %v289_v59  ;;  %v1420_v28 = vsel %vm1382_vm4, %v1042_v3, %v1419_v46  ;;  %v532_v50 = vadd.f32 %v531_v18, %v168_v44  ;;  %v927_v37 = vadd.f32 %v926_v7, %v333_v58  ;;  %v465_v9 = vld [vmem:[#allocation3 + $0xa70] sm:$0xff]  ;;  %v432_v41 = vld [vmem:[#allocation3 + $0x968] sm:$0xff] }
 0x10d   :  { %v1026_v63 = vadd.f32 %v1025_v45, %v377_v31  ;;  %v3824_v14 = vpack.c.bf16 %v3822_v2, %v3823_v25  ;;  %v1421_v26 = vsel %vm1384_vm5, %v1141_v8, %v1420_v28  ;;  %v631_v39 = vadd.f32 %v630_v32, %v212_v20  ;;  %v476_v29 = vld [vmem:[#allocation3 + $0xac8] sm:$0xff]  ;;  %v182_v25 = vld [vmem:[#allocation3 + $0x198] sm:$0xff] }
 0x10e   :  { %v730_v35 = vadd.f32 %v729_v40, %v256_v5  ;;  %v829_v36 = vadd.f32 %v828_v27, %v300_v4  ;;  %v3827_v47 = vpack.c.bf16 %v3825_v21, %v3826_v33  ;;  %v1422_v61 = vsel %vm1386_vm6, %v1240_v15, %v1421_v26  ;;  %v1650_v28 = vld [vmem:[#allocation6 + $0x488] sm:$0xff]  ;;  %v226_v26 = vld [vmem:[#allocation3 + $0x2f8] sm:$0xff]  ;;  %v281_v33 = vld [vmem:[#allocation3 + $0x4b0] sm:$0xff] }
 0x10f   :  { %2772 = vmatpush3.bf16.msra.mxu1 %v3824_v14  ;;  %v533_v34 = vrot.slane %v532_v50, 4  ;;  %v928_v48 = vadd.f32 %v927_v37, %v344_v30  ;;  %v1027_v49 = vadd.f32 %v1026_v63, %v388_v55  ;;  %1892 = vmatprep.mubr.f32.mxu0 %v1422_v61  ;;  %v632_v10 = vrot.slane %v631_v39, 4  ;;  %v1649_v30 = vld [vmem:[#allocation6 + $0x480] sm:$0xff]  ;;  %v193_v14 = vld [vmem:[#allocation3 + $0x1f0] sm:$0xff]  ;;  %v270_v21 = vld [vmem:[#allocation3 + $0x458] sm:$0xff] }
 0x110   :  { %2774 = vmatprep.subr.bf16.mxu1 %v3827_v47  ;;  %v731_v57 = vrot.slane %v730_v35, 4  ;;  %v830_v3 = vrot.slane %v829_v36, 4  ;;  %v1124_v8 = vadd.f32 %v410_v1, %v399_v0  ;;  %v1223_v52 = vadd.f32 %v454_v38, %v443_v22  ;;  %v138_v0 = vld [vmem:[#allocation3 + $0x38] sm:$0xff]  ;;  %v149_v1 = vld [vmem:[#allocation3 + $0x90] sm:$0xff] }
 0x111   :  { %v534_v42 = vadd.f32 %v533_v34, %v532_v50  ;;  %v929_v56 = vrot.slane %v928_v48, 4  ;;  %v1028_v16 = vrot.slane %v1027_v49, 4  ;;  %v633_v59 = vadd.f32 %v632_v10, %v631_v39 }
 0x112   :  { %v732_v60 = vadd.f32 %v731_v57, %v730_v35  ;;  %v831_v15 = vadd.f32 %v830_v3, %v829_v36  ;;  %v1125_v11 = vadd.f32 %v1124_v8, %v421_v62  ;;  %v1224_v44 = vadd.f32 %v1223_v52, %v465_v9  ;;  %v237_v36 = vld [vmem:[#allocation3 + $0x350] sm:$0xff]  ;;  %v248_v57 = vld [vmem:[#allocation3 + $0x3a8] sm:$0xff]  ;;  %v215_v52 = vld [vmem:[#allocation3 + $0x2a0] sm:$0xff] }
 0x113   :  { %2776 = vmatpush3.bf16.msra.mxu1 %v2775_v51  ;;  %v535_v12 = vrot.slane %v534_v42, 2  ;;  %v930_v17 = vadd.f32 %v929_v56, %v928_v48  ;;  %v1029_v43 = vadd.f32 %v1028_v16, %v1027_v49  ;;  %v3093_v58 = vmov 0.0|0.0   ;;  %v160_v48 = vld [vmem:[#allocation3 + $0xe8] sm:$0xff]  ;;  %v171_v16 = vld [vmem:[#allocation3 + $0x140] sm:$0xff] }
 0x114   :  { %2809 = vmatprep.subr.bf16.mxu1 %v3093_v58  ;;  %v634_v31 = vrot.slane %v633_v59, 2  ;;  %v733_v23 = vrot.slane %v732_v60, 2  ;;  %v832_v24 = vrot.slane %v831_v15, 2  ;;  %v1126_v6 = vadd.f32 %v1125_v11, %v432_v41  ;;  %v204_v49 = vld [vmem:[#allocation3 + $0x248] sm:$0xff] }
 0x115   :  { %v536_v13 = vadd.f32 %v535_v12, %v534_v42  ;;  %v931_v19 = vrot.slane %v930_v17, 2  ;;  %v1030_v53 = vrot.slane %v1029_v43, 2  ;;  %v1225_v51 = vadd.f32 %v1224_v44, %v476_v29  ;;  %v292_v3 = vld [vmem:[#allocation3 + $0x508] sm:$0xff]  ;;  %v259_v29 = vld [vmem:[#allocation3 + $0x400] sm:$0xff] }
 0x116   :  { %v635_v54 = vadd.f32 %v634_v31, %v633_v59  ;;  %v734_v20 = vadd.f32 %v733_v23, %v732_v60  ;;  %v833_v5 = vadd.f32 %v832_v24, %v831_v15  ;;  %v1127_v4 = vrot.slane %v1126_v6, 4  ;;  %v303_v12 = vld [vmem:[#allocation3 + $0x560] sm:$0xff] }
 0x117   :  { %v537_v18 = vrot.slane %v536_v13, 1  ;;  %v932_v7 = vadd.f32 %v931_v19, %v930_v17  ;;  %v1031_v45 = vadd.f32 %v1030_v53, %v1029_v43  ;;  %v1226_v46 = vrot.slane %v1225_v51, 4  ;;  %v314_v17 = vld [vmem:[#allocation3 + $0x5b8] sm:$0xff]  ;;  %v325_v43 = vld [vmem:[#allocation3 + $0x610] sm:$0xff] }
 0x118   :  { %v636_v55 = vrot.slane %v635_v54, 1  ;;  %v735_v32 = vrot.slane %v734_v20, 1  ;;  %v834_v40 = vrot.slane %v833_v5, 1  ;;  %v1128_v27 = vadd.f32 %v1127_v4, %v1126_v6  ;;  %v358_v6 = vld [vmem:[#allocation3 + $0x718] sm:$0xff] }
 0x119   :  { %v538_v50 = vadd.f32 %v537_v18, %v536_v13  ;;  %v933_v37 = vrot.slane %v932_v7, 1  ;;  %v1032_v63 = vrot.slane %v1031_v45, 1  ;;  %v1227_v2 = vadd.f32 %v1226_v46, %v1225_v51  ;;  %v369_v13 = vld [vmem:[#allocation3 + $0x770] sm:$0xff] }
 0x11a   :  { %v637_v22 = vadd.f32 %v636_v55, %v635_v54  ;;  %v736_v38 = vadd.f32 %v735_v32, %v734_v20  ;;  %v835_v39 = vadd.f32 %v834_v40, %v833_v5  ;;  %v1129_v35 = vrot.slane %v1128_v27, 2  ;;  %v336_v20 = vld [vmem:[#allocation3 + $0x668] sm:$0xff]  ;;  %v413_v46 = vld [vmem:[#allocation3 + $0x8d0] sm:$0xff] }
 0x11b   :  { %v934_v47 = vadd.f32 %v933_v37, %v932_v7  ;;  %v1033_v61 = vadd.f32 %v1032_v63, %v1031_v45  ;;  %v1228_v62 = vrot.slane %v1227_v2, 2  ;;  %v2777_v34 = vpack.c.bf16 %v1650_v28, %v1649_v30  ;;  %v380_v7 = vld [vmem:[#allocation3 + $0x7c8] sm:$0xff]  ;;  %v402_v45 = vld [vmem:[#allocation3 + $0x878] sm:$0xff] }
 0x11c   :  { %v1130_v9 = vadd.f32 %v1129_v35, %v1128_v27  ;;  %v1409_v10 = vsel %vm1374_vm0, %v637_v22, %v538_v50  ;;  %v557_v8 = vadd.f32 %v149_v1, %v138_v0  ;;  %v656_v41 = vadd.f32 %v193_v14, %v182_v25  ;;  %v347_v27 = vld [vmem:[#allocation3 + $0x6c0] sm:$0xff]  ;;  %v446_v28 = vld [vmem:[#allocation3 + $0x9d8] sm:$0xff]  ;;  %v457_v0 = vld [vmem:[#allocation3 + $0xa30] sm:$0xff] }
 0x11d   :  { %v1229_v42 = vadd.f32 %v1228_v62, %v1227_v2  ;;  %v1410_v56 = vsel %vm1376_vm1, %v736_v38, %v1409_v10  ;;  %2778 = vmatprep.subr.bf16.mxu0 %v2777_v34  ;;  %v755_v59 = vadd.f32 %v237_v36, %v226_v26  ;;  %v854_v60 = vadd.f32 %v281_v33, %v270_v21  ;;  %v391_v2 = vld [vmem:[#allocation3 + $0x820] sm:$0xff]  ;;  %v424_v25 = vld [vmem:[#allocation3 + $0x928] sm:$0xff] }
 0x11e   :  { %v1131_v15 = vrot.slane %v1130_v9, 1  ;;  %v1411_v11 = vsel %vm1378_vm2, %v835_v39, %v1410_v56  ;;  %v558_v44 = vadd.f32 %v557_v8, %v160_v48  ;;  %v657_v31 = vadd.f32 %v656_v41, %v204_v49  ;;  %v468_v38 = vld [vmem:[#allocation3 + $0xa88] sm:$0xff]  ;;  %v435_v33 = vld [vmem:[#allocation3 + $0x980] sm:$0xff] }
 0x11f   :  { %v1230_v23 = vrot.slane %v1229_v42, 1  ;;  %v1412_v24 = vsel %vm1380_vm3, %v934_v47, %v1411_v11  ;;  %v756_v19 = vadd.f32 %v755_v59, %v248_v57  ;;  %v855_v53 = vadd.f32 %v854_v60, %v292_v3  ;;  %v479_v48 = vld [vmem:[#allocation3 + $0xae0] sm:$0xff] }
 0x120   :  { %v1132_v51 = vadd.f32 %v1131_v15, %v1130_v9  ;;  %v1413_v54 = vsel %vm1382_vm4, %v1033_v61, %v1412_v24  ;;  %v559_v5 = vadd.f32 %v558_v44, %v171_v16  ;;  %v658_v4 = vadd.f32 %v657_v31, %v215_v52 }
 0x121   :  { %v1231_v18 = vadd.f32 %v1230_v23, %v1229_v42  ;;  %v757_v30 = vadd.f32 %v756_v19, %v259_v29  ;;  %v856_v55 = vadd.f32 %v855_v53, %v303_v12  ;;  %v953_v32 = vadd.f32 %v325_v43, %v314_v17  ;;  %v1634_v19 = vld [vmem:[#allocation6 + $0x408] sm:$0xff] }
 0x122   :  { %v1414_v40 = vsel %vm1384_vm5, %v1132_v51, %v1413_v54  ;;  %v560_v1 = vrot.slane %v559_v5, 4  ;;  %v659_v50 = vrot.slane %v658_v4, 4  ;;  %v1052_v37 = vadd.f32 %v369_v13, %v358_v6  ;;  %v1633_v13 = vld [vmem:[#allocation6 + $0x400] sm:$0xff] }
 0x123   :  { %v1415_v63 = vsel %vm1386_vm6, %v1231_v18, %v1414_v40  ;;  %v758_v14 = vrot.slane %v757_v30, 4  ;;  %v857_v26 = vrot.slane %v856_v55, 4  ;;  %v954_v22 = vadd.f32 %v953_v32, %v336_v20 }
 0x124   :  { %1893 = vmatmul.mubr.f32.vlgmr.msra.gmra.mrb[2].mxu0 %v1415_v63  ;;  %v561_v39 = vadd.f32 %v560_v1, %v559_v5  ;;  %v660_v35 = vadd.f32 %v659_v50, %v658_v4  ;;  %v1053_v36 = vadd.f32 %v1052_v37, %v380_v7  ;;  %v1151_v21 = vadd.f32 %v413_v46, %v402_v45  ;;  %v137_v5 = vld [vmem:[#allocation3 + $0x30] sm:$0xff]  ;;  %v148_v4 = vld [vmem:[#allocation3 + $0x88] sm:$0xff] }
 0x125   :  { %v759_v47 = vadd.f32 %v758_v14, %v757_v30  ;;  %v858_v61 = vadd.f32 %v857_v26, %v856_v55  ;;  %v955_v62 = vadd.f32 %v954_v22, %v347_v27  ;;  %v1250_v34 = vadd.f32 %v457_v0, %v446_v28  ;;  %v181_v30 = vld [vmem:[#allocation3 + $0x190] sm:$0xff]  ;;  %v192_v55 = vld [vmem:[#allocation3 + $0x1e8] sm:$0xff]  ;;  %v159_v0 = vld [vmem:[#allocation3 + $0xe0] sm:$0xff] }
 0x126   :  { %v562_v49 = vrot.slane %v561_v39, 2  ;;  %v661_v9 = vrot.slane %v660_v35, 2  ;;  %v1054_v10 = vadd.f32 %v1053_v36, %v391_v2  ;;  %v1152_v57 = vadd.f32 %v1151_v21, %v424_v25  ;;  %v225_v1 = vld [vmem:[#allocation3 + $0x2f0] sm:$0xff]  ;;  %v236_v50 = vld [vmem:[#allocation3 + $0x348] sm:$0xff]  ;;  %v203_v25 = vld [vmem:[#allocation3 + $0x240] sm:$0xff] }
 0x127   :  { %v760_v3 = vrot.slane %v759_v47, 2  ;;  %v859_v8 = vrot.slane %v858_v61, 2  ;;  %v956_v41 = vrot.slane %v955_v62, 4  ;;  %v1251_v42 = vadd.f32 %v1250_v34, %v468_v38  ;;  %v269_v14 = vld [vmem:[#allocation3 + $0x450] sm:$0xff]  ;;  %v280_v26 = vld [vmem:[#allocation3 + $0x4a8] sm:$0xff]  ;;  %v170_v36 = vld [vmem:[#allocation3 + $0x138] sm:$0xff] }
 0x128   :  { %v563_v56 = vadd.f32 %v562_v49, %v561_v39  ;;  %v662_v16 = vadd.f32 %v661_v9, %v660_v35  ;;  %v1055_v52 = vrot.slane %v1054_v10, 4  ;;  %v1153_v29 = vadd.f32 %v1152_v57, %v435_v33  ;;  %v247_v21 = vld [vmem:[#allocation3 + $0x3a0] sm:$0xff]  ;;  %v258_v57 = vld [vmem:[#allocation3 + $0x3f8] sm:$0xff] }
 0x129   :  { %v761_v59 = vadd.f32 %v760_v3, %v759_v47  ;;  %v860_v60 = vadd.f32 %v859_v8, %v858_v61  ;;  %v957_v15 = vadd.f32 %v956_v41, %v955_v62  ;;  %v1252_v11 = vadd.f32 %v1251_v42, %v479_v48  ;;  %v214_v62 = vld [vmem:[#allocation3 + $0x298] sm:$0xff]  ;;  %v291_v34 = vld [vmem:[#allocation3 + $0x500] sm:$0xff]  ;;  %v313_v3 = vld [vmem:[#allocation3 + $0x5b0] sm:$0xff] }
 0x12a   :  { %v564_v12 = vrot.slane %v563_v56, 1  ;;  %v663_v17 = vrot.slane %v662_v16, 1  ;;  %v1056_v43 = vadd.f32 %v1055_v52, %v1054_v10  ;;  %v1154_v44 = vrot.slane %v1153_v29, 4  ;;  %v324_v8 = vld [vmem:[#allocation3 + $0x608] sm:$0xff]  ;;  %v302_v52 = vld [vmem:[#allocation3 + $0x558] sm:$0xff] }
 0x12b   :  { %v762_v31 = vrot.slane %v761_v59, 1  ;;  %v861_v23 = vrot.slane %v860_v60, 1  ;;  %v958_v24 = vrot.slane %v957_v15, 2  ;;  %v1253_v6 = vrot.slane %v1252_v11, 4 }
 0x12c   :  { %v565_v53 = vadd.f32 %v564_v12, %v563_v56  ;;  %v664_v51 = vadd.f32 %v663_v17, %v662_v16  ;;  %v1057_v54 = vrot.slane %v1056_v43, 2  ;;  %v1155_v20 = vadd.f32 %v1154_v44, %v1153_v29  ;;  %v357_v29 = vld [vmem:[#allocation3 + $0x710] sm:$0xff]  ;;  %v335_v17 = vld [vmem:[#allocation3 + $0x660] sm:$0xff] }
 0x12d   :  { %v763_v18 = vadd.f32 %v762_v31, %v761_v59  ;;  %v862_v7 = vadd.f32 %v861_v23, %v860_v60  ;;  %v959_v45 = vadd.f32 %v958_v24, %v957_v15  ;;  %v1254_v46 = vadd.f32 %v1253_v6, %v1252_v11  ;;  %v368_v59 = vld [vmem:[#allocation3 + $0x768] sm:$0xff]  ;;  %v379_v23 = vld [vmem:[#allocation3 + $0x7c0] sm:$0xff]  ;;  %v401_v24 = vld [vmem:[#allocation3 + $0x870] sm:$0xff] }
 0x12e   :  { %v1058_v32 = vadd.f32 %v1057_v54, %v1056_v43  ;;  %v1156_v40 = vrot.slane %v1155_v20, 2  ;;  %v1430_v27 = vsel %vm1374_vm0, %v664_v51, %v565_v53  ;;  %v2779_v28 = vpack.c.bf16 %v1634_v19, %v1633_v13  ;;  %v412_v6 = vld [vmem:[#allocation3 + $0x8c8] sm:$0xff]  ;;  %v346_v54 = vld [vmem:[#allocation3 + $0x6b8] sm:$0xff] }
 0x12f   :  { %v960_v37 = vrot.slane %v959_v45, 1  ;;  %v1255_v63 = vrot.slane %v1254_v46, 2  ;;  %v1431_v2 = vsel %vm1376_vm1, %v763_v18, %v1430_v27  ;;  %v548_v22 = vadd.f32 %v148_v4, %v137_v5  ;;  %v456_v5 = vld [vmem:[#allocation3 + $0xa28] sm:$0xff]  ;;  %v467_v27 = vld [vmem:[#allocation3 + $0xa80] sm:$0xff] }
 0x130   :  { %v1059_v38 = vrot.slane %v1058_v32, 1  ;;  %v1157_v39 = vadd.f32 %v1156_v40, %v1155_v20  ;;  %v1432_v35 = vsel %vm1378_vm2, %v862_v7, %v1431_v2  ;;  %2780 = vmatpush3.bf16.msra.mxu0 %v2779_v28  ;;  %v647_v33 = vadd.f32 %v192_v55, %v181_v30  ;;  %v445_v20 = vld [vmem:[#allocation3 + $0x9d0] sm:$0xff]  ;;  %v423_v30 = vld [vmem:[#allocation3 + $0x920] sm:$0xff] }
 0x131   :  { %v961_v47 = vadd.f32 %v960_v37, %v959_v45  ;;  %v1256_v61 = vadd.f32 %v1255_v63, %v1254_v46  ;;  %v549_v48 = vadd.f32 %v548_v22, %v159_v0  ;;  %v746_v49 = vadd.f32 %v236_v50, %v225_v1  ;;  %v390_v46 = vld [vmem:[#allocation3 + $0x818] sm:$0xff] }
 0x132   :  { %v1060_v9 = vadd.f32 %v1059_v38, %v1058_v32  ;;  %v1158_v10 = vrot.slane %v1157_v39, 1  ;;  %v648_v41 = vadd.f32 %v647_v33, %v203_v25  ;;  %v845_v42 = vadd.f32 %v280_v26, %v269_v14  ;;  %v434_v37 = vld [vmem:[#allocation3 + $0x978] sm:$0xff] }
 0x133   :  { %v1257_v56 = vrot.slane %v1256_v61, 1  ;;  %v1433_v16 = vsel %vm1380_vm3, %v961_v47, %v1432_v35  ;;  %v550_v60 = vadd.f32 %v549_v48, %v170_v36  ;;  %v747_v15 = vadd.f32 %v746_v49, %v247_v21  ;;  %v478_v26 = vld [vmem:[#allocation3 + $0xad8] sm:$0xff] }
 0x134   :  { %v1159_v11 = vadd.f32 %v1158_v10, %v1157_v39  ;;  %v1434_v12 = vsel %vm1382_vm4, %v1060_v9, %v1433_v16  ;;  %v649_v43 = vadd.f32 %v648_v41, %v214_v62  ;;  %v846_v44 = vadd.f32 %v845_v42, %v291_v34  ;;  %v1652_v16 = vld [vmem:[#allocation6 + $0x498] sm:$0xff] }
 0x135   :  { %v1258_v31 = vadd.f32 %v1257_v56, %v1256_v61  ;;  %v551_v13 = vrot.slane %v550_v60, 4  ;;  %v748_v19 = vadd.f32 %v747_v15, %v258_v57  ;;  %v944_v53 = vadd.f32 %v324_v8, %v313_v3  ;;  %v1651_v56 = vld [vmem:[#allocation6 + $0x490] sm:$0xff] }
 0x136   :  { %v1435_v51 = vsel %vm1384_vm5, %v1159_v11, %v1434_v12  ;;  %v650_v4 = vrot.slane %v649_v43, 4  ;;  %v847_v18 = vadd.f32 %v846_v44, %v302_v52  ;;  %v1043_v7 = vadd.f32 %v368_v59, %v357_v29  ;;  %v1635_v52 = vld [vmem:[#allocation6 + $0x410] sm:$0xff]  ;;  %v1636_v11 = vld [vmem:[#allocation6 + $0x418] sm:$0xff]  ;;  %v3520_v12 = vld [vmem:[#allocation6 + $0x500] sm:$0xff] }
 0x137   :  { %v1436_v45 = vsel %vm1386_vm6, %v1258_v31, %v1435_v51  ;;  %v552_v55 = vadd.f32 %v551_v13, %v550_v60  ;;  %v749_v32 = vrot.slane %v748_v19, 4  ;;  %v945_v40 = vadd.f32 %v944_v53, %v335_v17  ;;  %v3522_v17 = vld [vmem:[#allocation6 + $0x508] sm:$0xff]  ;;  %v3526_v13 = vld [vmem:[#allocation6 + $0x420] sm:$0xff] }
 0x138   :  { %1962 = vmatprep.mubr.f32.mxu1 %v1436_v45  ;;  %v651_v28 = vadd.f32 %v650_v4, %v649_v43  ;;  %v848_v0 = vrot.slane %v847_v18, 4  ;;  %v1044_v1 = vadd.f32 %v1043_v7, %v379_v23  ;;  %v1142_v50 = vadd.f32 %v412_v6, %v401_v24  ;;  %v3524_v24 = vld [vmem:[#allocation6 + $0x4a0] sm:$0xff]  ;;  %v1654_v6 = vld [vmem:[#allocation6 + $0x4a8] sm:$0xff]  ;;  %v3532_v4 = vld [vmem:[#allocation6 + $0x518] sm:$0xff] }
 0x139   :  { %v553_v63 = vrot.slane %v552_v55, 2  ;;  %v750_v2 = vadd.f32 %v749_v32, %v748_v19  ;;  %v946_v25 = vadd.f32 %v945_v40, %v346_v54  ;;  %v1241_v14 = vadd.f32 %v456_v5, %v445_v20  ;;  %v3528_v19 = vld [vmem:[#allocation6 + $0x428] sm:$0xff]  ;;  %v3530_v5 = vld [vmem:[#allocation6 + $0x510] sm:$0xff]  ;;  %v3536_v7 = vld [vmem:[#allocation6 + $0x4b8] sm:$0xff] }
 0x13a   :  { %v652_v22 = vrot.slane %v651_v28, 2  ;;  %v849_v38 = vadd.f32 %v848_v0, %v847_v18  ;;  %v1045_v39 = vadd.f32 %v1044_v1, %v390_v46  ;;  %v1143_v35 = vadd.f32 %v1142_v50, %v423_v30  ;;  %v3534_v18 = vld [vmem:[#allocation6 + $0x4b0] sm:$0xff]  ;;  %v3541_v40 = vld [vmem:[#allocation6 + $0x438] sm:$0xff] }
 0x13b   :  { %v554_v36 = vadd.f32 %v553_v63, %v552_v55  ;;  %v751_v21 = vrot.slane %v750_v2, 2  ;;  %v947_v33 = vrot.slane %v946_v25, 4  ;;  %v1242_v47 = vadd.f32 %v1241_v14, %v467_v27  ;;  %v3539_v32 = vld [vmem:[#allocation6 + $0x430] sm:$0xff]  ;;  %v3543_v27 = vld [vmem:[#allocation6 + $0x520] sm:$0xff]  ;;  %v3554_v14 = vld [vmem:[#allocation6 + $0x448] sm:$0xff] }
 0x13c   :  { %v653_v61 = vadd.f32 %v652_v22, %v651_v28  ;;  %v850_v62 = vrot.slane %v849_v38, 2  ;;  %v1046_v34 = vrot.slane %v1045_v39, 4  ;;  %v1144_v48 = vadd.f32 %v1143_v35, %v434_v37  ;;  %v3545_v28 = vld [vmem:[#allocation6 + $0x528] sm:$0xff]  ;;  %v3548_v63 = vld [vmem:[#allocation6 + $0x4c0] sm:$0xff]  ;;  %v3559_v35 = vld [vmem:[#allocation6 + $0x530] sm:$0xff] }
 0x13d   :  { %v555_v49 = vrot.slane %v554_v36, 1  ;;  %v752_v9 = vadd.f32 %v751_v21, %v750_v2  ;;  %v948_v10 = vadd.f32 %v947_v33, %v946_v25  ;;  %v1243_v57 = vadd.f32 %v1242_v47, %v478_v26  ;;  %v3550_v2 = vld [vmem:[#allocation6 + $0x4c8] sm:$0xff]  ;;  %v3552_v25 = vld [vmem:[#allocation6 + $0x440] sm:$0xff]  ;;  %v3563_v21 = vld [vmem:[#allocation6 + $0x4d0] sm:$0xff] }
 0x13e   :  { %v654_v3 = vrot.slane %v653_v61, 1  ;;  %v851_v8 = vadd.f32 %v850_v62, %v849_v38  ;;  %v1047_v41 = vadd.f32 %v1046_v34, %v1045_v39  ;;  %v1145_v42 = vrot.slane %v1144_v48, 4  ;;  %v3565_v33 = vld [vmem:[#allocation6 + $0x4d8] sm:$0xff]  ;;  %v3567_v47 = vld [vmem:[#allocation6 + $0x450] sm:$0xff] }
 0x13f   :  { %v556_v29 = vadd.f32 %v555_v49, %v554_v36  ;;  %v753_v59 = vrot.slane %v752_v9, 1  ;;  %v949_v60 = vrot.slane %v948_v10, 2  ;;  %v1244_v15 = vrot.slane %v1243_v57, 4  ;;  %v3561_v36 = vld [vmem:[#allocation6 + $0x538] sm:$0xff] }
 0x140   :  { %v655_v43 = vadd.f32 %v654_v3, %v653_v61  ;;  %v852_v44 = vrot.slane %v851_v8, 1  ;;  %v1048_v31 = vrot.slane %v1047_v41, 2  ;;  %v1146_v23 = vadd.f32 %v1145_v42, %v1144_v48  ;;  %v3569_v61 = vld [vmem:[#allocation6 + $0x458] sm:$0xff]  ;;  %v3580_v3 = vld [vmem:[#allocation6 + $0x4e8] sm:$0xff] }
 0x141   :  { %v754_v53 = vadd.f32 %v753_v59, %v752_v9  ;;  %v950_v51 = vadd.f32 %v949_v60, %v948_v10  ;;  %v1245_v54 = vadd.f32 %v1244_v15, %v1243_v57  ;;  %v2781_v20 = vpack.c.bf16 %v1652_v16, %v1651_v56  ;;  %v3574_v9 = vld [vmem:[#allocation6 + $0x540] sm:$0xff]  ;;  %v3576_v10 = vld [vmem:[#allocation6 + $0x548] sm:$0xff]  ;;  %v3592_v59 = vld [vmem:[#allocation6 + $0x558] sm:$0xff] }
 0x142   :  { %v853_v45 = vadd.f32 %v852_v44, %v851_v8  ;;  %v1049_v46 = vadd.f32 %v1048_v31, %v1047_v41  ;;  %v1147_v30 = vrot.slane %v1146_v23, 2  ;;  %v1423_v55 = vsel %vm1374_vm0, %v655_v43, %v556_v29  ;;  %v3578_v57 = vld [vmem:[#allocation6 + $0x4e0] sm:$0xff]  ;;  %v3584_v41 = vld [vmem:[#allocation6 + $0x468] sm:$0xff]  ;;  %v3590_v29 = vld [vmem:[#allocation6 + $0x550] sm:$0xff] }
 0x143   :  { %v951_v0 = vrot.slane %v950_v51, 1  ;;  %v1246_v1 = vrot.slane %v1245_v54, 2  ;;  %v1424_v50 = vsel %vm1376_vm1, %v754_v53, %v1423_v55  ;;  %2782 = vmatprep.subr.bf16.mxu0 %v2781_v20  ;;  %v2783_v37 = vpack.c.bf16 %v1636_v11, %v1635_v52  ;;  %v3582_v8 = vld [vmem:[#allocation6 + $0x460] sm:$0xff]  ;;  %v3594_v60 = vld [vmem:[#allocation6 + $0x4f0] sm:$0xff]  ;;  %v3596_v15 = vld [vmem:[#allocation6 + $0x4f8] sm:$0xff] }
 0x144   :  { %v1050_v26 = vrot.slane %v1049_v46, 1  ;;  %v1148_v22 = vadd.f32 %v1147_v30, %v1146_v23  ;;  %v1425_v38 = vsel %vm1378_vm2, %v853_v45, %v1424_v50  ;;  %v2810_v39 = vpack.c.bf16 %v3522_v17, %v3520_v12  ;;  %v3598_v11 = vld [vmem:[#allocation6 + $0x470] sm:$0xff]  ;;  %v3600_v43 = vld [vmem:[#allocation6 + $0x478] sm:$0xff]  ;;  %v151_v53 = vld [vmem:[#allocation3 + $0xa0] sm:$0xff] }
 0x145   :  { %v952_v62 = vadd.f32 %v951_v0, %v950_v51  ;;  %v1247_v34 = vadd.f32 %v1246_v1, %v1245_v54  ;;  %2784 = vmatpush3.bf16.msra.mxu0 %v2783_v37  ;;  %v2785_v48 = vpack.c.bf16 %v1654_v6, %v3524_v24  ;;  %v2787_v49 = vpack.c.bf16 %v3528_v19, %v3526_v13  ;;  %v3607_v6 = vld [vmem:[#allocation6 + $0x560] sm:$0xff]  ;;  %v3609_v13 = vld [vmem:[#allocation6 + $0x568] sm:$0xff]  ;;  %v162_v1 = vld [vmem:[#allocation3 + $0xf8] sm:$0xff] }
 0x146   :  { %v1051_v42 = vadd.f32 %v1050_v26, %v1049_v46  ;;  %v1149_v56 = vrot.slane %v1148_v22, 1  ;;  %v2789_v52 = vpack.c.bf16 %v3536_v7, %v3534_v18  ;;  %v2791_v23 = vpack.c.bf16 %v3541_v40, %v3539_v32  ;;  %3828 = vst [vmem:[#allocation22_spill] sm:$0xff] %v3607_v6  ;;  %3829 = vst [vmem:[#allocation21_spill] sm:$0xff] %v3609_v13  ;;  %v140_v19 = vld [vmem:[#allocation3 + $0x48] sm:$0xff]  ;;  %v195_v45 = vld [vmem:[#allocation3 + $0x200] sm:$0xff] }
 0x147   :  { %v1248_v44 = vrot.slane %v1247_v34, 1  ;;  %v1426_v31 = vsel %vm1380_vm3, %v952_v62, %v1425_v38  ;;  %2786 = vmatprep.subr.bf16.mxu0 %v2785_v48  ;;  %v184_v51 = vld [vmem:[#allocation3 + $0x1a8] sm:$0xff]  ;;  %v2793_v18 = vpack.c.bf16 %v3550_v2, %v3548_v63  ;;  %v239_v30 = vld [vmem:[#allocation3 + $0x360] sm:$0xff]  ;;  %v206_v50 = vld [vmem:[#allocation3 + $0x258] sm:$0xff]  ;;  %v575_v0 = vadd.f32 %v151_v53, %v140_v19 }
 0x148   :  { %v1150_v54 = vadd.f32 %v1149_v56, %v1148_v22  ;;  %v1427_v20 = vsel %vm1382_vm4, %v1051_v42, %v1426_v31  ;;  %v228_v46 = vld [vmem:[#allocation3 + $0x308] sm:$0xff]  ;;  %v283_v63 = vld [vmem:[#allocation3 + $0x4c0] sm:$0xff]  ;;  %v173_v31 = vld [vmem:[#allocation3 + $0x150] sm:$0xff]  ;;  %v674_v56 = vadd.f32 %v195_v45, %v184_v51 }
 0x149   :  { %v1249_v55 = vadd.f32 %v1248_v44, %v1247_v34  ;;  %2788 = vmatpush3.bf16.msra.mxu0 %v2787_v49  ;;  %v272_v37 = vld [vmem:[#allocation3 + $0x468] sm:$0xff]  ;;  %v327_v34 = vld [vmem:[#allocation3 + $0x620] sm:$0xff]  ;;  %v294_v22 = vld [vmem:[#allocation3 + $0x518] sm:$0xff]  ;;  %v773_v24 = vadd.f32 %v239_v30, %v228_v46  ;;  %v576_v19 = vadd.f32 %v575_v0, %v162_v1  ;;  %v3830_v0 = vpack.c.bf16 %v3532_v4, %v3530_v5 }
 0x14a   :  { %v316_v2 = vld [vmem:[#allocation3 + $0x5c8] sm:$0xff]  ;;  %v1428_v26 = vsel %vm1384_vm5, %v1150_v54, %v1427_v20  ;;  %2790 = vmatprep.subr.bf16.mxu0 %v2789_v52  ;;  %v371_v49 = vld [vmem:[#allocation3 + $0x780] sm:$0xff]  ;;  %v217_v54 = vld [vmem:[#allocation3 + $0x2b0] sm:$0xff]  ;;  %v872_v7 = vadd.f32 %v283_v63, %v272_v37  ;;  %v675_v53 = vadd.f32 %v674_v56, %v206_v50  ;;  %v3832_v50 = vpack.c.bf16 %v3565_v33, %v3563_v21 }
 0x14b   :  { %v360_v48 = vld [vmem:[#allocation3 + $0x728] sm:$0xff]  ;;  %v1429_v42 = vsel %vm1386_vm6, %v1249_v55, %v1428_v26  ;;  %v250_v20 = vld [vmem:[#allocation3 + $0x3b8] sm:$0xff]  ;;  %v415_v26 = vld [vmem:[#allocation3 + $0x8e0] sm:$0xff]  ;;  %v971_v16 = vadd.f32 %v327_v34, %v316_v2  ;;  %v577_v37 = vadd.f32 %v576_v19, %v173_v31  ;;  %v3834_v21 = vpack.c.bf16 %v3569_v61, %v3567_v47 }
 0x14c   :  { %v338_v32 = vld [vmem:[#allocation3 + $0x678] sm:$0xff]  ;;  %1963 = vmatmul.mubr.f32.vlgmr.msra.gmra.mrb[2].mxu1 %v1429_v42  ;;  %v404_v55 = vld [vmem:[#allocation3 + $0x888] sm:$0xff]  ;;  %v261_v44 = vld [vmem:[#allocation3 + $0x410] sm:$0xff]  ;;  %v1070_v42 = vadd.f32 %v371_v49, %v360_v48  ;;  %v774_v51 = vadd.f32 %v773_v24, %v250_v20  ;;  %v873_v46 = vadd.f32 %v872_v7, %v294_v22  ;;  %v676_v63 = vadd.f32 %v675_v53, %v217_v54 }
 0x14d   :  { %v382_v38 = vld [vmem:[#allocation3 + $0x7d8] sm:$0xff]  ;;  %2811 = vmatpush3.bf16.msra.mxu1 %v2810_v39  ;;  %2792 = vmatpush3.bf16.msra.mxu0 %v2791_v23  ;;  %v448_v52 = vld [vmem:[#allocation3 + $0x9e8] sm:$0xff]  ;;  %v459_v40 = vld [vmem:[#allocation3 + $0xa40] sm:$0xff]  ;;  %v972_v12 = vadd.f32 %v971_v16, %v338_v32  ;;  %v1169_v39 = vadd.f32 %v415_v26, %v404_v55  ;;  %v3095_v23 = vmov 0.0   ;;  %v3831_v24 = vpack.c.bf16 %v3554_v14, %v3552_v25 }
 0x14e   :  { %2812 = vmatprep.subr.bf16.mxu1 %v3093_v58  ;;  %2794 = vmatprep.subr.bf16.mxu0 %v2793_v18  ;;  %v305_v62 = vld [vmem:[#allocation3 + $0x570] sm:$0xff]  ;;  %v426_v45 = vld [vmem:[#allocation3 + $0x938] sm:$0xff]  ;;  %v1071_v17 = vadd.f32 %v1070_v42, %v382_v38  ;;  %v775_v18 = vadd.f32 %v774_v51, %v261_v44  ;;  %v1268_v2 = vadd.f32 %v459_v40, %v448_v52  ;;  %v578_v22 = vrot.slane %v577_v37, 4 }
 0x14f   :  { %v349_v6 = vld [vmem:[#allocation3 + $0x6d0] sm:$0xff]  ;;  %2576 = vmatprep.mubr.msk.f32.mxu1 %vm3094_vm7, %v3095_v23  ;;  %v470_v30 = vld [vmem:[#allocation3 + $0xa98] sm:$0xff]  ;;  %v874_v7 = vadd.f32 %v873_v46, %v305_v62  ;;  %v677_v40 = vrot.slane %v676_v63, 4  ;;  %v1170_v34 = vadd.f32 %v1169_v39, %v426_v45  ;;  %v3835_v31 = vpack.c.bf16 %v3580_v3, %v3578_v57 }
 0x150   :  { %v393_v13 = vld [vmem:[#allocation3 + $0x830] sm:$0xff]  ;;  %v973_v32 = vadd.f32 %v972_v12, %v349_v6  ;;  %v776_v38 = vrot.slane %v775_v18, 4  ;;  %v1269_v49 = vadd.f32 %v1268_v2, %v470_v30  ;;  %v579_v14 = vadd.f32 %v578_v22, %v577_v37 }
 0x151   :  { %2814 = vmatpush3.bf16.msra.mxu1 %v3830_v0  ;;  %2796 = vmatpush3.bf16.msra.mxu0 %v3831_v24  ;;  %v437_v16 = vld [vmem:[#allocation3 + $0x990] sm:$0xff]  ;;  %v1072_v1 = vadd.f32 %v1071_v17, %v393_v13  ;;  %v875_v5 = vrot.slane %v874_v7, 4  ;;  %v678_v56 = vadd.f32 %v677_v40, %v676_v63  ;;  %v3833_v13 = vpack.c.bf16 %v3545_v28, %v3543_v27  ;;  %v183_v24 = vld [vmem:[#allocation3 + $0x1a0] sm:$0xff]  ;;  %v238_v40 = vld [vmem:[#allocation3 + $0x358] sm:$0xff] }
 0x152   :  { %2815 = vmatprep.subr.bf16.mxu1 %v3093_v58  ;;  %2798 = vmatprep.subr.bf16.mxu0 %v3832_v50  ;;  %v974_v4 = vrot.slane %v973_v32, 4  ;;  %v481_v25 = vld [vmem:[#allocation3 + $0xaf0] sm:$0xff]  ;;  %v777_v62 = vadd.f32 %v776_v38, %v775_v18  ;;  %v1171_v6 = vadd.f32 %v1170_v34, %v437_v16  ;;  %v580_v54 = vrot.slane %v579_v14, 2  ;;  %v194_v16 = vld [vmem:[#allocation3 + $0x1f8] sm:$0xff] }
 0x153   :  { %v1073_v48 = vrot.slane %v1072_v1, 4  ;;  %v876_v33 = vadd.f32 %v875_v5, %v874_v7  ;;  %v679_v20 = vrot.slane %v678_v56, 2  ;;  %v1270_v19 = vadd.f32 %v1269_v49, %v481_v25  ;;  %v227_v7 = vld [vmem:[#allocation3 + $0x300] sm:$0xff]  ;;  %v161_v25 = vld [vmem:[#allocation3 + $0xf0] sm:$0xff] }
 0x154   :  { %v975_v52 = vadd.f32 %v974_v4, %v973_v32  ;;  %v778_v55 = vrot.slane %v777_v62, 2  ;;  %v1172_v26 = vrot.slane %v1171_v6, 4  ;;  %v581_v53 = vadd.f32 %v580_v54, %v579_v14  ;;  %v205_v14 = vld [vmem:[#allocation3 + $0x250] sm:$0xff] }
 0x155   :  { %2817 = vmatpush3.bf16.msra.mxu1 %v3833_v13  ;;  %2800 = vmatpush3.bf16.msra.mxu0 %v3834_v21  ;;  %v1074_v44 = vadd.f32 %v1073_v48, %v1072_v1  ;;  %v877_v42 = vrot.slane %v876_v33, 2  ;;  %v680_v47 = vadd.f32 %v679_v20, %v678_v56  ;;  %v3836_v45 = vpack.c.bf16 %v3561_v36, %v3559_v35  ;;  %v139_v35 = vld [vmem:[#allocation3 + $0x40] sm:$0xff]  ;;  %v150_v36 = vld [vmem:[#allocation3 + $0x98] sm:$0xff]  ;;  %v249_v13 = vld [vmem:[#allocation3 + $0x3b0] sm:$0xff] }
 0x156   :  { %2818 = vmatprep.subr.bf16.mxu1 %v3093_v58  ;;  %2802 = vmatprep.subr.bf16.mxu0 %v3835_v31  ;;  %v976_v27 = vrot.slane %v975_v52, 2  ;;  %v779_v61 = vadd.f32 %v778_v55, %v777_v62  ;;  %v1173_v51 = vadd.f32 %v1172_v26, %v1171_v6  ;;  %v3837_v57 = vpack.c.bf16 %v3584_v41, %v3582_v8  ;;  %v172_v6 = vld [vmem:[#allocation3 + $0x148] sm:$0xff]  ;;  %v293_v21 = vld [vmem:[#allocation3 + $0x510] sm:$0xff] }
 0x157   :  { %v1075_v28 = vrot.slane %v1074_v44, 2  ;;  %v878_v3 = vadd.f32 %v877_v42, %v876_v33  ;;  %v1271_v17 = vrot.slane %v1270_v19, 4  ;;  %v3838_v39 = vpack.c.bf16 %v3596_v15, %v3594_v60  ;;  %v271_v60 = vld [vmem:[#allocation3 + $0x460] sm:$0xff]  ;;  %v282_v15 = vld [vmem:[#allocation3 + $0x4b8] sm:$0xff]  ;;  %v216_v33 = vld [vmem:[#allocation3 + $0x2a8] sm:$0xff] }
 0x158   :  { %v977_v46 = vadd.f32 %v976_v27, %v975_v52  ;;  %v582_v30 = vrot.slane %v581_v53, 1  ;;  %v681_v37 = vrot.slane %v680_v47, 1  ;;  %v780_v63 = vrot.slane %v779_v61, 1  ;;  %v315_v52 = vld [vmem:[#allocation3 + $0x5c0] sm:$0xff]  ;;  %v260_v26 = vld [vmem:[#allocation3 + $0x408] sm:$0xff] }
 0x159   :  { %2820 = vmatpush3.bf16.msra.mxu1 %v3836_v45  ;;  %2804 = vmatpush3.bf16.msra.mxu0 %v3837_v57  ;;  %v1076_v12 = vadd.f32 %v1075_v28, %v1074_v44  ;;  %v1174_v18 = vrot.slane %v1173_v51, 2  ;;  %v879_v2 = vrot.slane %v878_v3, 1  ;;  %v1272_v41 = vadd.f32 %v1271_v17, %v1270_v19  ;;  %v326_v44 = vld [vmem:[#allocation3 + $0x618] sm:$0xff]  ;;  %v304_v42 = vld [vmem:[#allocation3 + $0x568] sm:$0xff] }
 0x15a   :  { %2821 = vmatprep.subr.bf16.mxu1 %v3093_v58  ;;  %2806 = vmatprep.subr.bf16.mxu0 %v3838_v39  ;;  %v978_v0 = vrot.slane %v977_v46, 1  ;;  %v583_v32 = vadd.f32 %v582_v30, %v581_v53  ;;  %v682_v1 = vadd.f32 %v681_v37, %v680_v47  ;;  %v781_v50 = vadd.f32 %v780_v63, %v779_v61  ;;  %v337_v61 = vld [vmem:[#allocation3 + $0x670] sm:$0xff]  ;;  %v370_v45 = vld [vmem:[#allocation3 + $0x778] sm:$0xff] }
 0x15b   :  { %v1077_v8 = vrot.slane %v1076_v12, 1  ;;  %v1175_v22 = vadd.f32 %v1174_v18, %v1173_v51  ;;  %v3839_v38 = vpack.c.bf16 %v3576_v10, %v3574_v9  ;;  %v3840_v34 = vpack.c.bf16 %v3600_v43, %v3598_v11  ;;  %v359_v51 = vld [vmem:[#allocation3 + $0x720] sm:$0xff]  ;;  %v414_v17 = vld [vmem:[#allocation3 + $0x8d8] sm:$0xff]  ;;  %v381_v18 = vld [vmem:[#allocation3 + $0x7d0] sm:$0xff] }
 0x15c   :  { %v880_v5 = vadd.f32 %v879_v2, %v878_v3  ;;  %v979_v4 = vadd.f32 %v978_v0, %v977_v46  ;;  %v1273_v49 = vrot.slane %v1272_v41, 2  ;;  %v1444_v62 = vsel %vm1374_vm0, %v682_v1, %v583_v32  ;;  %v425_v2 = vld [vmem:[#allocation3 + $0x930] sm:$0xff]  ;;  %v447_v0 = vld [vmem:[#allocation3 + $0x9e0] sm:$0xff] }
 0x15d   :  { %2823 = vmatpush3.bf16.msra.mxu1 %v3839_v38  ;;  %2808 = vmatpush3.bf16.msra.mxu0 %v3840_v34  ;;  %v1078_v48 = vadd.f32 %v1077_v8, %v1076_v12  ;;  %v1176_v56 = vrot.slane %v1175_v22, 1  ;;  %v566_v9 = vadd.f32 %v150_v36, %v139_v35  ;;  %v665_v10 = vadd.f32 %v194_v16, %v183_v24  ;;  %v403_v12 = vld [vmem:[#allocation3 + $0x880] sm:$0xff]  ;;  %v458_v8 = vld [vmem:[#allocation3 + $0xa38] sm:$0xff]  ;;  %v3842_v32 = vld [vmem:[#allocation21_spill] sm:$0xff] }
 0x15e   :  { %2824 = vmatprep.subr.bf16.mxu1 %v3093_v58  ;;  %2833 = vmatprep.subr.bf16.mxu0 %v3093_v58  ;;  %v1274_v11 = vadd.f32 %v1273_v49, %v1272_v41  ;;  %v1445_v43 = vsel %vm1376_vm1, %v781_v50, %v1444_v62  ;;  %v764_v31 = vadd.f32 %v238_v40, %v227_v7  ;;  %v3843_v1 = vld [vmem:[#allocation22_spill] sm:$0xff]  ;;  %v392_v40 = vld [vmem:[#allocation3 + $0x828] sm:$0xff] }
 0x15f   :  { %v863_v54 = vadd.f32 %v282_v15, %v271_v60  ;;  %v1177_v20 = vadd.f32 %v1176_v56, %v1175_v22  ;;  %v1446_v55 = vsel %vm1378_vm2, %v880_v5, %v1445_v43  ;;  %v567_v27 = vadd.f32 %v566_v9, %v161_v25  ;;  %v436_v34 = vld [vmem:[#allocation3 + $0x988] sm:$0xff]  ;;  %v469_v5 = vld [vmem:[#allocation3 + $0xa90] sm:$0xff] }
 0x160   :  { %v666_v28 = vadd.f32 %v665_v10, %v205_v14  ;;  %v3841_v19 = vpack.c.bf16 %v3592_v59, %v3590_v29  ;;  %v1275_v53 = vrot.slane %v1274_v11, 1  ;;  %v1447_v47 = vsel %vm1380_vm3, %v979_v4, %v1446_v55  ;;  %v348_v59 = vld [vmem:[#allocation3 + $0x6c8] sm:$0xff] }
 0x161   :  { %v765_v57 = vadd.f32 %v764_v31, %v249_v13  ;;  %v864_v3 = vadd.f32 %v863_v54, %v293_v21  ;;  %v1448_v46 = vsel %vm1382_vm4, %v1078_v48, %v1447_v47  ;;  %v568_v39 = vadd.f32 %v567_v27, %v172_v6  ;;  %v480_v13 = vld [vmem:[#allocation3 + $0xae8] sm:$0xff] }
 0x162   :  { %2826 = vmatpush3.bf16.msra.mxu1 %v3841_v19  ;;  %v667_v30 = vadd.f32 %v666_v28, %v216_v33  ;;  %v962_v37 = vadd.f32 %v326_v44, %v315_v52  ;;  %v1276_v63 = vadd.f32 %v1275_v53, %v1274_v11  ;;  %v1449_v29 = vsel %vm1384_vm5, %v1177_v20, %v1448_v46  ;;  %v1679_v46 = vld [vmem:[#allocation6 + $0x570] sm:$0xff] }
 0x163   :  { %2827 = vmatprep.subr.bf16.mxu1 %v3093_v58  ;;  %v766_v35 = vadd.f32 %v765_v57, %v260_v26  ;;  %v865_v36 = vadd.f32 %v864_v3, %v304_v42  ;;  %v569_v41 = vrot.slane %v568_v39, 4  ;;  %v1061_v7 = vadd.f32 %v370_v45, %v359_v51 }
 0x164   :  { %v668_v24 = vrot.slane %v667_v30, 4  ;;  %v963_v16 = vadd.f32 %v962_v37, %v337_v61  ;;  %v3844_v50 = vpack.c.bf16 %v3842_v32, %v3843_v1  ;;  %v1450_v22 = vsel %vm1386_vm6, %v1276_v63, %v1449_v29  ;;  %v141_v63 = vld [vmem:[#allocation3 + $0x50] sm:$0xff]  ;;  %v152_v29 = vld [vmem:[#allocation3 + $0xa8] sm:$0xff] }
 0x165   :  { %v767_v60 = vrot.slane %v766_v35, 4  ;;  %v866_v15 = vrot.slane %v865_v36, 4  ;;  %v1160_v38 = vadd.f32 %v414_v17, %v403_v12  ;;  %2032 = vmatprep.mubr.f32.mxu0 %v1450_v22  ;;  %v570_v4 = vadd.f32 %v569_v41, %v568_v39  ;;  %v1680_v12 = vld [vmem:[#allocation6 + $0x578] sm:$0xff]  ;;  %v229_v32 = vld [vmem:[#allocation3 + $0x310] sm:$0xff]  ;;  %v240_v1 = vld [vmem:[#allocation3 + $0x368] sm:$0xff] }
 0x166   :  { %2829 = vmatpush3.bf16.msra.mxu1 %v3844_v50  ;;  %v669_v48 = vadd.f32 %v668_v24, %v667_v30  ;;  %v964_v49 = vadd.f32 %v963_v16, %v348_v59  ;;  %v1062_v25 = vadd.f32 %v1061_v7, %v381_v18  ;;  %v1259_v6 = vadd.f32 %v458_v8, %v447_v0  ;;  %v196_v0 = vld [vmem:[#allocation3 + $0x208] sm:$0xff]  ;;  %v163_v7 = vld [vmem:[#allocation3 + $0x100] sm:$0xff] }
 0x167   :  { %v768_v14 = vadd.f32 %v767_v60, %v766_v35  ;;  %v867_v56 = vadd.f32 %v866_v15, %v865_v36  ;;  %v1161_v62 = vadd.f32 %v1160_v38, %v425_v2  ;;  %2830 = vmatprep.subr.bf16.mxu1 %v3093_v58  ;;  %v571_v21 = vrot.slane %v570_v4, 2  ;;  %v185_v2 = vld [vmem:[#allocation3 + $0x1b0] sm:$0xff]  ;;  %v207_v60 = vld [vmem:[#allocation3 + $0x260] sm:$0xff]  ;;  %v284_v38 = vld [vmem:[#allocation3 + $0x4c8] sm:$0xff] }
 0x168   :  { %v670_v9 = vrot.slane %v669_v48, 2  ;;  %v965_v10 = vrot.slane %v964_v49, 4  ;;  %v1063_v11 = vadd.f32 %v1062_v25, %v392_v40  ;;  %v1260_v44 = vadd.f32 %v1259_v6, %v469_v5  ;;  %v273_v15 = vld [vmem:[#allocation3 + $0x470] sm:$0xff]  ;;  %v218_v25 = vld [vmem:[#allocation3 + $0x2b8] sm:$0xff] }
 0x169   :  { %v769_v43 = vrot.slane %v768_v14, 2  ;;  %v868_v33 = vrot.slane %v867_v56, 2  ;;  %v1162_v52 = vadd.f32 %v1161_v62, %v436_v34  ;;  %v572_v31 = vadd.f32 %v571_v21, %v570_v4  ;;  %v317_v21 = vld [vmem:[#allocation3 + $0x5d0] sm:$0xff] }
 0x16a   :  { %v671_v54 = vadd.f32 %v670_v9, %v669_v48  ;;  %v966_v20 = vadd.f32 %v965_v10, %v964_v49  ;;  %v1064_v55 = vrot.slane %v1063_v11, 4  ;;  %v1261_v28 = vadd.f32 %v1260_v44, %v480_v13  ;;  %v174_v49 = vld [vmem:[#allocation3 + $0x158] sm:$0xff]  ;;  %v295_v13 = vld [vmem:[#allocation3 + $0x520] sm:$0xff]  ;;  %v328_v9 = vld [vmem:[#allocation3 + $0x628] sm:$0xff] }
 0x16b   :  { %v770_v26 = vadd.f32 %v769_v43, %v768_v14  ;;  %v869_v42 = vadd.f32 %v868_v33, %v867_v56  ;;  %v1163_v27 = vrot.slane %v1162_v52, 4  ;;  %v573_v19 = vrot.slane %v572_v31, 1  ;;  %v251_v14 = vld [vmem:[#allocation3 + $0x3c0] sm:$0xff]  ;;  %v306_v44 = vld [vmem:[#allocation3 + $0x578] sm:$0xff] }
 0x16c   :  { %v672_v53 = vrot.slane %v671_v54, 1  ;;  %v967_v47 = vrot.slane %v966_v20, 2  ;;  %v1065_v61 = vadd.f32 %v1064_v55, %v1063_v11  ;;  %v1262_v3 = vrot.slane %v1261_v28, 4 }
 0x16d   :  { %v771_v51 = vrot.slane %v770_v26, 1  ;;  %v870_v45 = vrot.slane %v869_v42, 1  ;;  %v1164_v57 = vadd.f32 %v1163_v27, %v1162_v52  ;;  %v574_v17 = vadd.f32 %v573_v19, %v572_v31  ;;  %v262_v52 = vld [vmem:[#allocation3 + $0x418] sm:$0xff]  ;;  %v372_v27 = vld [vmem:[#allocation3 + $0x788] sm:$0xff] }
 0x16e   :  { %v673_v39 = vadd.f32 %v672_v53, %v671_v54  ;;  %v968_v30 = vadd.f32 %v967_v47, %v966_v20  ;;  %v1066_v37 = vrot.slane %v1065_v61, 2  ;;  %v1263_v36 = vadd.f32 %v1262_v3, %v1261_v28  ;;  %v405_v47 = vld [vmem:[#allocation3 + $0x890] sm:$0xff] }
 0x16f   :  { %v772_v59 = vadd.f32 %v771_v51, %v770_v26  ;;  %v871_v18 = vadd.f32 %v870_v45, %v869_v42  ;;  %v1165_v35 = vrot.slane %v1164_v57, 2  ;;  %v2831_v16 = vpack.c.bf16 %v1680_v12, %v1679_v46  ;;  %v339_v26 = vld [vmem:[#allocation3 + $0x680] sm:$0xff]  ;;  %v361_v42 = vld [vmem:[#allocation3 + $0x730] sm:$0xff]  ;;  %v350_v12 = vld [vmem:[#allocation3 + $0x6d8] sm:$0xff] }
 0x170   :  { %v969_v8 = vrot.slane %v968_v30, 1  ;;  %v1067_v41 = vadd.f32 %v1066_v37, %v1065_v61  ;;  %v1437_v24 = vsel %vm1374_vm0, %v673_v39, %v574_v17  ;;  %v1264_v22 = vrot.slane %v1263_v36, 2  ;;  %v416_v61 = vld [vmem:[#allocation3 + $0x8e8] sm:$0xff]  ;;  %v383_v17 = vld [vmem:[#allocation3 + $0x7e0] sm:$0xff] }
 0x171   :  { %v1166_v50 = vadd.f32 %v1165_v35, %v1164_v57  ;;  %v1438_v40 = vsel %vm1376_vm1, %v772_v59, %v1437_v24  ;;  %v584_v34 = vadd.f32 %v152_v29, %v141_v63  ;;  %2832 = vmatpush3.bf16.msra.mxu1 %v2831_v16  ;;  %v683_v56 = vadd.f32 %v196_v0, %v185_v2  ;;  %v427_v37 = vld [vmem:[#allocation3 + $0x940] sm:$0xff]  ;;  %v449_v63 = vld [vmem:[#allocation3 + $0x9f0] sm:$0xff]  ;;  %v460_v29 = vld [vmem:[#allocation3 + $0xa48] sm:$0xff] }
 0x172   :  { %v970_v5 = vadd.f32 %v969_v8, %v968_v30  ;;  %v1068_v4 = vrot.slane %v1067_v41, 1  ;;  %v1439_v48 = vsel %vm1378_vm2, %v871_v18, %v1438_v40  ;;  %v1265_v6 = vadd.f32 %v1264_v22, %v1263_v36  ;;  %2857 = vmatprep.subr.bf16.mxu1 %v3093_v58  ;;  %v394_v0 = vld [vmem:[#allocation3 + $0x838] sm:$0xff] }
 0x173   :  { %v1167_v62 = vrot.slane %v1166_v50, 1  ;;  %v585_v10 = vadd.f32 %v584_v34, %v163_v7  ;;  %v782_v11 = vadd.f32 %v240_v1, %v229_v32  ;;  %v684_v31 = vadd.f32 %v683_v56, %v207_v60  ;;  %v438_v16 = vld [vmem:[#allocation3 + $0x998] sm:$0xff]  ;;  %v471_v7 = vld [vmem:[#allocation3 + $0xaa0] sm:$0xff] }
 0x174   :  { %v1069_v43 = vadd.f32 %v1068_v4, %v1067_v41  ;;  %v1440_v33 = vsel %vm1380_vm3, %v970_v5, %v1439_v48  ;;  %v881_v54 = vadd.f32 %v284_v38, %v273_v15  ;;  %v1266_v55 = vrot.slane %v1265_v6, 1  ;;  %v482_v34 = vld [vmem:[#allocation3 + $0xaf8] sm:$0xff] }
 0x175   :  { %v1168_v20 = vadd.f32 %v1167_v62, %v1166_v50  ;;  %v586_v28 = vadd.f32 %v585_v10, %v174_v49  ;;  %v783_v19 = vadd.f32 %v782_v11, %v251_v14  ;;  %v685_v51 = vadd.f32 %v684_v31, %v218_v25 }
 0x176   :  { %v1441_v53 = vsel %vm1382_vm4, %v1069_v43, %v1440_v33  ;;  %v882_v45 = vadd.f32 %v881_v54, %v295_v13  ;;  %v980_v57 = vadd.f32 %v328_v9, %v317_v21  ;;  %v1267_v3 = vadd.f32 %v1266_v55, %v1265_v6 }
 0x177   :  { %v1442_v46 = vsel %vm1384_vm5, %v1168_v20, %v1441_v53  ;;  %v587_v39 = vrot.slane %v586_v28, 4  ;;  %v784_v30 = vadd.f32 %v783_v19, %v262_v52  ;;  %v686_v59 = vrot.slane %v685_v51, 4 }
 0x178   :  { %v883_v18 = vadd.f32 %v882_v45, %v306_v44  ;;  %v981_v35 = vadd.f32 %v980_v57, %v339_v26  ;;  %v1079_v36 = vadd.f32 %v372_v27, %v361_v42  ;;  %v1443_v2 = vsel %vm1386_vm6, %v1267_v3, %v1442_v46 }
 0x179   :  { %v588_v8 = vadd.f32 %v587_v39, %v586_v28  ;;  %v785_v41 = vrot.slane %v784_v30, 4  ;;  %v1178_v24 = vadd.f32 %v416_v61, %v405_v47  ;;  %2033 = vmatmul.mubr.f32.vlgmr.msra.gmra.mrb[4].mxu0 %v1443_v2  ;;  %v687_v32 = vadd.f32 %v686_v59, %v685_v51 }
 0x17a   :  { %v884_v1 = vrot.slane %v883_v18, 4  ;;  %v982_v50 = vadd.f32 %v981_v35, %v350_v12  ;;  %v1080_v22 = vadd.f32 %v1079_v36, %v383_v17  ;;  %v1277_v38 = vadd.f32 %v460_v29, %v449_v63  ;;  %2611 = vmatprep.mubr.msk.f32.mxu0 %vm3094_vm7, %v3095_v23 }
 0x17b   :  { %v589_v40 = vrot.slane %v588_v8, 2  ;;  %v786_v60 = vadd.f32 %v785_v41, %v784_v30  ;;  %v1179_v15 = vadd.f32 %v1178_v24, %v427_v37  ;;  %v688_v5 = vrot.slane %v687_v32, 2 }
 0x17c   :  { %v885_v4 = vadd.f32 %v884_v1, %v883_v18  ;;  %v983_v48 = vrot.slane %v982_v50, 4  ;;  %v1081_v49 = vadd.f32 %v1080_v22, %v394_v0  ;;  %v1278_v62 = vadd.f32 %v1277_v38, %v471_v7  ;;  %v2109_v1 = vld [vmem:[#allocation9] sm:$0xff]  ;;  %v2111_v22 = vld [vmem:[#allocation9 + $0x10] sm:$0xff] }
 0x17d   :  { %v590_v25 = vadd.f32 %v589_v40, %v588_v8  ;;  %v787_v14 = vrot.slane %v786_v60, 2  ;;  %v1180_v56 = vadd.f32 %v1179_v15, %v438_v16  ;;  %v689_v6 = vadd.f32 %v688_v5, %v687_v32  ;;  %v2113_v38 = vld [vmem:[#allocation9 + $0x20] sm:$0xff] }
 0x17e   :  { %v886_v13 = vrot.slane %v885_v4, 2  ;;  %v984_v21 = vadd.f32 %v983_v48, %v982_v50  ;;  %v1082_v9 = vrot.slane %v1081_v49, 4  ;;  %v1279_v33 = vadd.f32 %v1278_v62, %v482_v34  ;;  %v2110_v50 = vld [vmem:[#allocation9 + $0x8] sm:$0xff]  ;;  %v2120_v62 = vld [vmem:[#allocation9 + $0x58] sm:$0xff] }
 0x17f   :  { %v591_v10 = vrot.slane %v590_v25, 1  ;;  %v788_v11 = vadd.f32 %v787_v14, %v786_v60  ;;  %v1181_v43 = vrot.slane %v1180_v56, 4  ;;  %v690_v52 = vrot.slane %v689_v6, 1  ;;  %v2112_v60 = vld [vmem:[#allocation9 + $0x18] sm:$0xff]  ;;  %v2114_v34 = vld [vmem:[#allocation9 + $0x28] sm:$0xff] }
 0x180   :  { %v887_v44 = vadd.f32 %v886_v13, %v885_v4  ;;  %v985_v31 = vrot.slane %v984_v21, 2  ;;  %v1083_v54 = vadd.f32 %v1082_v9, %v1081_v49  ;;  %v1280_v42 = vrot.slane %v1279_v33, 4  ;;  %v2115_v4 = vld [vmem:[#allocation9 + $0x30] sm:$0xff]  ;;  %v2117_v49 = vld [vmem:[#allocation9 + $0x40] sm:$0xff]  ;;  %v2315_v13 = vld [vmem:[#allocation8] ss:$0 sm:$0xff] }
 0x181   :  { %v592_v20 = vadd.f32 %v591_v10, %v590_v25  ;;  %v789_v55 = vrot.slane %v788_v11, 1  ;;  %v1182_v26 = vadd.f32 %v1181_v43, %v1180_v56  ;;  %v691_v27 = vadd.f32 %v690_v52, %v689_v6  ;;  %v2118_v25 = vld [vmem:[#allocation9 + $0x48] sm:$0xff]  ;;  %v2119_v56 = vld [vmem:[#allocation9 + $0x50] sm:$0xff] }
 0x182   :  { %v888_v28 = vrot.slane %v887_v44, 1  ;;  %v986_v19 = vadd.f32 %v985_v31, %v984_v21  ;;  %v1084_v53 = vrot.slane %v1083_v54, 2  ;;  %v1281_v51 = vadd.f32 %v1280_v42, %v1279_v33  ;;  %v2121_v33 = vld [vmem:[#allocation9 + $0x60] sm:$0xff]  ;;  %v2122_v52 = vld [vmem:[#allocation9 + $0x68] sm:$0xff]  ;;  %v2123_v31 = vld [vmem:[#allocation9 + $0x70] sm:$0xff] }
 0x183   :  { %v790_v47 = vadd.f32 %v789_v55, %v788_v11  ;;  %v1183_v61 = vrot.slane %v1182_v26, 2  ;;  %v1451_v46 = vsel %vm1374_vm0, %v691_v27, %v592_v20  ;;  %v2834_v40 = vpack.c.bf16 %v2110_v50, %v2109_v1  ;;  %v2203_v55 = vld [vmem:[#allocation12] sm:$0xff]  ;;  %v2205_v42 = vld [vmem:[#allocation12 + $0x10] sm:$0xff] }
 0x184   :  { %v889_v45 = vadd.f32 %v888_v28, %v887_v44  ;;  %v987_v57 = vrot.slane %v986_v19, 1  ;;  %v1085_v3 = vadd.f32 %v1084_v53, %v1083_v54  ;;  %v1282_v17 = vrot.slane %v1281_v51, 2  ;;  %v2124_v54 = vld [vmem:[#allocation9 + $0x78] sm:$0xff]  ;;  %v2207_v53 = vld [vmem:[#allocation12 + $0x20] sm:$0xff] }
 0x185   :  { %v1184_v12 = vadd.f32 %v1183_v61, %v1182_v26  ;;  %v1452_v39 = vsel %vm1376_vm1, %v790_v47, %v1451_v46  ;;  %2835 = vmatpush3.bf16.msra.mxu0 %v2834_v40  ;;  %v2837_v15 = vpack.c.bf16 %v2112_v60, %v2111_v22  ;;  %v2840_v5 = vpack.c.bf16 %v2114_v34, %v2113_v38  ;;  %v2204_v26 = vld [vmem:[#allocation12 + $0x8] sm:$0xff]  ;;  %v2206_v28 = vld [vmem:[#allocation12 + $0x18] sm:$0xff]  ;;  %v2217_v60 = vld [vmem:[#allocation12 + $0x70] sm:$0xff] }
 0x186   :  { %v988_v30 = vadd.f32 %v987_v57, %v986_v19  ;;  %v1086_v37 = vrot.slane %v1085_v3, 1  ;;  %v1453_v63 = vsel %vm1378_vm2, %v889_v45, %v1452_v39  ;;  %v1283_v59 = vadd.f32 %v1282_v17, %v1281_v51  ;;  %2836 = vmatprep.subr.bf16.mxu0 %v3093_v58  ;;  %v2208_v47 = vld [vmem:[#allocation12 + $0x28] sm:$0xff]  ;;  %v2209_v51 = vld [vmem:[#allocation12 + $0x30] sm:$0xff]  ;;  %v2210_v45 = vld [vmem:[#allocation12 + $0x38] sm:$0xff] }
 0x187   :  { %v1185_v29 = vrot.slane %v1184_v12, 1  ;;  %v2846_v14 = vpack.c.bf16 %v2118_v25, %v2117_v49  ;;  %v2849_v6 = vpack.c.bf16 %v2120_v62, %v2119_v56  ;;  %v2852_v44 = vpack.c.bf16 %v2122_v52, %v2121_v33  ;;  %v2212_v46 = vld [vmem:[#allocation12 + $0x48] sm:$0xff]  ;;  %v2213_v17 = vld [vmem:[#allocation12 + $0x50] sm:$0xff]  ;;  %v2214_v39 = vld [vmem:[#allocation12 + $0x58] sm:$0xff] }
 0x188   :  { %v1087_v18 = vadd.f32 %v1086_v37, %v1085_v3  ;;  %v1454_v35 = vsel %vm1380_vm3, %v988_v30, %v1453_v63  ;;  %v1284_v2 = vrot.slane %v1283_v59, 1  ;;  %v2855_v20 = vpack.c.bf16 %v2124_v54, %v2123_v31  ;;  %v2211_v3 = vld [vmem:[#allocation12 + $0x40] sm:$0xff]  ;;  %v2316_v34 = vld [vmem:[#allocation11] ss:$0 sm:$0xff] }
 0x189   :  { %v1186_v36 = vadd.f32 %v1185_v29, %v1184_v12  ;;  %2838 = vmatpush3.bf16.msra.mxu0 %v2837_v15  ;;  %v2858_v27 = vpack.c.bf16 %v2204_v26, %v2203_v55  ;;  %v2861_v19 = vpack.c.bf16 %v2206_v28, %v2205_v42  ;;  %v2864_v61 = vpack.c.bf16 %v2208_v47, %v2207_v53  ;;  %v2218_v15 = vld [vmem:[#allocation12 + $0x78] sm:$0xff] }
 0x18a   :  { %v1455_v0 = vsel %vm1382_vm4, %v1087_v18, %v1454_v35  ;;  %v1285_v8 = vadd.f32 %v1284_v2, %v1283_v59  ;;  %2839 = vmatprep.subr.bf16.mxu0 %v3093_v58  ;;  %v2867_v57 = vpack.c.bf16 %v2210_v45, %v2209_v51  ;;  %v2870_v12 = vpack.c.bf16 %v2212_v46, %v2211_v3  ;;  %v2215_v59 = vld [vmem:[#allocation12 + $0x60] sm:$0xff]  ;;  %v2216_v18 = vld [vmem:[#allocation12 + $0x68] sm:$0xff] }
 0x18b   :  { %v1456_v41 = vsel %vm1384_vm5, %v1186_v36, %v1455_v0  ;;  %v2873_v29 = vpack.c.bf16 %v2214_v39, %v2213_v17  ;;  %v2876_v36 = vpack.c.bf16 %v2216_v18, %v2215_v59  ;;  %v2879_v38 = vpack.c.bf16 %v2218_v15, %v2217_v60 }
 0x18c   :  { %v1457_v24 = vsel %vm1386_vm6, %v1285_v8, %v1456_v41 }
 0x18d   :  { %2577 = vmatmul.mubr.f32.vlgmr.msra.gmra.mrb[4].mxu1 %v1457_v24  ;;  %2841 = vmatpush3.bf16.msra.mxu0 %v2840_v5 }
 0x18e   :  { %2646 = vmatprep.mubr.msk.f32.mxu1 %vm3094_vm7, %v3095_v23  ;;  %v2116_v23 = vld [vmem:[#allocation9 + $0x38] sm:$0xff]  ;;  %2842 = vmatprep.subr.bf16.mxu0 %v3093_v58 }
 0x18f   :  { %v2843_v48 = vpack.c.bf16 %v2116_v23, %v2115_v4  ;;  %2859 = vmatpush3.bf16.msra.mxu1 %v2858_v27 }
 0x190   :  { %2860 = vmatprep.subr.bf16.mxu1 %v3093_v58 }
 0x191   :  { %2844 = vmatpush3.bf16.msra.mxu0 %v2843_v48  ;;  %v2317_v48 = vld [vmem:[#allocation14] ss:$0 sm:$0xff] }
 0x192   :  { %2845 = vmatprep.subr.bf16.mxu0 %v3093_v58 }
 0x193   :  { %2862 = vmatpush3.bf16.msra.mxu1 %v2861_v19 }
 0x194   :  { %2863 = vmatprep.subr.bf16.mxu1 %v3093_v58 }
 0x195   :  { %2847 = vmatpush3.bf16.msra.mxu0 %v2846_v14 }
 0x196   :  { %2848 = vmatprep.subr.bf16.mxu0 %v3093_v58 }
 0x197   :  { %2865 = vmatpush3.bf16.msra.mxu1 %v2864_v61 }
 0x198   :  { %2866 = vmatprep.subr.bf16.mxu1 %v3093_v58 }
 0x199   :  { %v2350_v16 = vpop.f32.mrb[0].mxu0  ;;  %2850 = vmatpush3.bf16.msra.mxu0 %v2849_v6 }
 0x19a   :  { %v2351_v7 = vpop.f32.mrb[1].mxu0  ;;  %2851 = vmatprep.subr.bf16.mxu0 %v3093_v58 }
 0x19b   :  { %v2352_v32 = vadd.f32 %v2351_v7, %v2350_v16  ;;  %2868 = vmatpush3.bf16.msra.mxu1 %v2867_v57 }
 0x19c   :  { %2869 = vmatprep.subr.bf16.mxu1 %v3093_v58 }
 0x19d   :  { %v1755_v21 = vadd.f32 %v2352_v32, %v2315_v13  ;;  %2853 = vmatpush3.bf16.msra.mxu0 %v2852_v44 }
 0x19e   :  { %2854 = vmatprep.subr.bf16.mxu0 %v3093_v58 }
 0x19f   :  { %2871 = vmatpush3.bf16.msra.mxu1 %v2870_v12 }
 0x1a0   :  { %2872 = vmatprep.subr.bf16.mxu1 %v3093_v58 }
 0x1a1   :  { %2856 = vmatpush3.bf16.msra.mxu0 %v2855_v20 }
 0x1a3   :  { %2874 = vmatpush3.bf16.msra.mxu1 %v2873_v29 }
 0x1a4   :  { %2875 = vmatprep.subr.bf16.mxu1 %v3093_v58 }
 0x1a7   :  { %2877 = vmatpush3.bf16.msra.mxu1 %v2876_v36 }
 0x1a8   :  { %2878 = vmatprep.subr.bf16.mxu1 %v3093_v58 }
 0x1ab   :  { %2880 = vmatpush3.bf16.msra.mxu1 %v2879_v38 }
 0x1c1   :  { %v2385_v9 = vpop.f32.mrb[0].mxu1 }
 0x1c2   :  { %v2386_v10 = vpop.f32.mrb[1].mxu1 }
 0x1c3   :  { %v2387_v11 = vadd.f32 %v2386_v10, %v2385_v9 }
 0x1c5   :  { %v1825_v43 = vadd.f32 %v2387_v11, %v1755_v21 }
 0x1f7   :  { %v2420_v30 = vpop.f32.mrb[2].mxu0 }
 0x1f8   :  { %v2421_v37 = vpop.f32.mrb[3].mxu0 }
 0x1f9   :  { %v2422_v63 = vadd.f32 %v2421_v37, %v2420_v30 }
 0x1fb   :  { %v1895_v35 = vadd.f32 %v2422_v63, %v1825_v43 }
 0x21f   :  { %v2455_v2 = vpop.f32.mrb[2].mxu1 }
 0x220   :  { %v2456_v0 = vpop.f32.mrb[3].mxu1 }
 0x221   :  { %v2457_v8 = vadd.f32 %v2456_v0, %v2455_v2 }
 0x223   :  { %v1965_v41 = vadd.f32 %v2457_v8, %v1895_v35 }
 0x24c   :  { %v2490_v24 = vpop.f32.mrb[4].mxu0 }
 0x24d   :  { %v2491_v16 = vpop.f32.mrb[5].mxu0 }
 0x24e   :  { %v2492_v7 = vadd.f32 %v2491_v16, %v2490_v24 }
 0x250   :  { %v2035_v32 = vadd.f32 %v2492_v7, %v1965_v41 }
 0x260   :  { %v2104_v1 = vpop.f32.mrb[4].mxu1 }
 0x261   :  { %v2105_v50 = vadd.f32 %v2104_v1, %v2035_v32  ;;  %v2578_v22 = vpop.f32.mrb[5].mxu1 }
 0x263   :  { %v2108_v40 = vmax.f32 %v2105_v50, 0.0 }
 0x265   :  { %2612 = vmatmul.mubr.f32.vlgmr.msra.gmra.mrb[6].mxu0 %v2108_v40 }
 0x338   :  { %v2198_v5 = vpop.f32.mrb[6].mxu0 }
 0x339   :  { %v2199_v58 = vadd.f32 %v2316_v34, %v2198_v5  ;;  %v2613_v4 = vpop.f32.mrb[7].mxu0 }
 0x33b   :  { %v2202_v23 = vmax.f32 %v2199_v58, 0.0 }
 0x33d   :  { %2647 = vmatmul.mubr.f32.vlgmr.msra.gmra.mrb[6].mxu1 %v2202_v23 }
 0x410   :  { %v2292_v49 = vpop.f32.mrb[6].mxu1 }
 0x411   :  { %v2293_v25 = vadd.f32 %v2317_v48, %v2292_v49  ;;  %v2648_v14 = vpop.f32.mrb[7].mxu1 }
 0x413   :  { %2296 = vst [vmem:[#allocation15] sm:$0xff] %v2293_v25 }
 0x414   :  { %3061 = shalt.err (!%p3058_p4)
}
 0x415   :  { %s3062_s17 = scalar_lea.hbm %s3749_s7, 128 }
 0x416   :  { %p3063_p5 = scmp.ne.s32.totalorder %s3749_s7, %s3062_s17  ;;  %p3066_p6 = scmp.lt.u32.totalorder %s3062_s17, %s3749_s7 }
 0x418   :  { %p3068_p7 = pnand %p3066_p6, %p3063_p5 }
 0x41a   :  { %3071 = shalt.err (!%p3068_p7)
}
 0x41b   :  { %2306 = dma.vmem_to_hbm [thread:$0]  %s2304_s3, 128, %s3749_s7, [#allocation5]  }
 0x41c   :  { %3080 = dma.done.wait [#allocation5], 128  }
 0x41d   :  { %3081 = vsyncadd [#allocation5], 4294967168 }
 0x41e   :  { %2310 = vsyncpa [#allocation4], 1 }
 0x41f   :  { %2311 = vsyncpa [#allocation7], 1 }
 0x420   :  { %2312 = vsyncpa [#allocation10], 1 }
 0x421   :  { %2313 = vsyncpa [#allocation13], 1 }
 0x422   :  { %2314 = vsyncpa [#allocation5], 1 }

</bundles_post_ra>
